<compile_context>
chip_gen: v7x
topology: tpu7x:2x2x1
jax: 0.10.0
libtpu: 0.0.40
codegen_flags: <defaults>
</compile_context>

<pallas_src>
import functools

import jax
import jax.numpy as jnp
from jax.experimental import pallas as pl
from jax.experimental.pallas import tpu as pltpu

NUM_LAYERS = 8
EPS = 1e-8
LANE = 128
SUBLANE = 8


def _round_up(n, m):
    return ((n + m - 1) // m) * m


# --------------------------------------------------------------------------- #
# Kernel                                                                      #
# --------------------------------------------------------------------------- #
def _mapping_kernel(x_ref, w0_ref, w_ref, b_ref, o_ref, *, z_dim):
    """x_ref: [TB, K0] f32, w0_ref: [K0, D] bf16, w_ref: [7, D, D] bf16,
    b_ref: [8, 1, D] f32, o_ref: [TB, D].  The WSLinear scale sqrt(2/in) is
    already folded into the (transposed) weights."""
    x = x_ref[...].astype(jnp.float32)

    # PixelNorm over the true feature count (padded x columns are zero).
    sum_sq = jnp.sum(x * x, axis=1, keepdims=True)
    x = x * jax.lax.rsqrt(sum_sq * (1.0 / z_dim) + EPS)

    # Layer 0: [TB, K0] @ [K0, D]  (no wasted zero K-columns).
    x = jnp.dot(x.astype(jnp.bfloat16), w0_ref[...],
                preferred_element_type=jnp.float32) + b_ref[0]
    x = jnp.maximum(x, 0.0)

    # Layers 1..7: [TB, D] @ [D, D]; ReLU between layers, none after the last.
    for i in range(1, NUM_LAYERS):
        x = jnp.dot(x.astype(jnp.bfloat16), w_ref[i - 1],
                    preferred_element_type=jnp.float32) + b_ref[i]
        if i < NUM_LAYERS - 1:
            x = jnp.maximum(x, 0.0)

    o_ref[...] = x.astype(o_ref.dtype)


# --------------------------------------------------------------------------- #
# One-time parameter prep (do NOT pay this per call)                          #
# --------------------------------------------------------------------------- #
def prepare_params(weights, biases, scales):
    """weights[i]: [out, in] (PyTorch layout), biases[i]: [out], scales[i]: float.
    Returns (w0 [K0, D] bf16, w_rest [7, D, D] bf16, b_slab [8, 1, D] f32)."""
    z_dim = weights[0].shape[1]
    w_dim = weights[0].shape[0]
    K0 = _round_up(z_dim, LANE)
    D = _round_up(w_dim, LANE)

    w0 = jnp.zeros((K0, D), jnp.float32)
    w0 = w0.at[:z_dim, :w_dim].set(
        jnp.asarray(weights[0], jnp.float32).T * float(scales[0]))

    w_rest = jnp.zeros((NUM_LAYERS - 1, D, D), jnp.float32)
    b_slab = jnp.zeros((NUM_LAYERS, 1, D), jnp.float32)
    b_slab = b_slab.at[0, 0, :w_dim].set(jnp.asarray(biases[0], jnp.float32))
    for i in range(1, NUM_LAYERS):
        wt = jnp.asarray(weights[i], jnp.float32).T * float(scales[i])
        w_rest = w_rest.at[i - 1, :wt.shape[0], :wt.shape[1]].set(wt)
        b_slab = b_slab.at[i, 0, :biases[i].shape[0]].set(
            jnp.asarray(biases[i], jnp.float32))
    return w0.astype(jnp.bfloat16), w_rest.astype(jnp.bfloat16), b_slab


# --------------------------------------------------------------------------- #
# Wrapper                                                                     #
# --------------------------------------------------------------------------- #
def mapping_network_pallas(x, w0, w_rest, b_slab, z_dim, w_dim, *,
                           max_tb=512, out_dtype=jnp.float32):
    """x: [B, z_dim]. w0/w_rest/b_slab from prepare_params. Returns [B, w_dim].

    max_tb: batch-tile cap. 512 amortizes the 256-wide MXU weight loads on
    v6e/v7x; on v5e (128x128 MXU, 16 MiB scoped VMEM) 256 is already enough.
    """
    # TODO(synk): latency path (single-tile batch) could hide the 8-layer weight
    # slab DMA via pl.ANY + per-layer make_async_copy double-buffering; omitted,
    # only matters for tiny-B serving calls.
    B = x.shape[0]
    K0, D = w0.shape

    # Batch tile: divide B tightly and use >= 2 grid steps when possible so the
    # "parallel" batch axis spans both v7x TensorCores.
    num_tiles = pl.cdiv(B, max_tb)
    if B >= 2 * SUBLANE:
        num_tiles = max(num_tiles, 2)
    TB = _round_up(pl.cdiv(B, num_tiles), SUBLANE)
    B_pad = _round_up(B, TB)
    grid = (B_pad // TB,)

    # Pad batch/features only when actually needed (the pad is a separate
    # mem-bound XLA op). Padding is neutral: padded columns are zero, padded
    # rows are discarded by the final slice.
    x = x.astype(jnp.float32)
    if (B_pad, K0) == (B, x.shape[1]):
        x_in = x
    else:
        x_in = jnp.zeros((B_pad, K0), jnp.float32).at[:B, :x.shape[1]].set(x)

    kernel = functools.partial(_mapping_kernel, z_dim=z_dim)

    def _call(single_buffer_weights):
        res_kw = ({"pipeline_mode": pl.Buffered(1)}
                  if single_buffer_weights else {})
        wbuf = 1 if single_buffer_weights else 2
        est = (2 * TB * K0 * 4 + 2 * TB * D * 4                 # x / out tiles
               + wbuf * (w0.size * 2 + w_rest.size * 2 + b_slab.size * 4))
        vmem_limit = min(max(int(est * 1.25) + (1 << 20), 16 << 20), 64 << 20)
        return pl.pallas_call(
            kernel,
            out_shape=jax.ShapeDtypeStruct((B_pad, D), out_dtype),
            grid=grid,
            in_specs=[
                pl.BlockSpec((TB, K0), lambda i: (i, 0)),               # x tile
                pl.BlockSpec((K0, D), lambda i: (0, 0), **res_kw),      # layer-0 W
                pl.BlockSpec((NUM_LAYERS - 1, D, D),
                             lambda i: (0, 0, 0), **res_kw),            # W 1..7
                pl.BlockSpec((NUM_LAYERS, 1, D),
                             lambda i: (0, 0, 0), **res_kw),            # biases
            ],
            out_specs=pl.BlockSpec((TB, D), lambda i: (i, 0)),
            compiler_params=pltpu.CompilerParams(
                dimension_semantics=("parallel",),
                vmem_limit_bytes=vmem_limit),
        )(x_in, w0, w_rest, b_slab)

    try:
        out = _call(True)                  # single-buffered resident weights
    except Exception:                      # fallback: default double buffering
        out = _call(False)

    if (B_pad, D) != (B, w_dim):
        out = out[:B, :w_dim]
    return out


# --------------------------------------------------------------------------- #
# References                                                                  #
# --------------------------------------------------------------------------- #
def mapping_network_ref_f32(x, weights, biases, scales):
    """Pure-f32 JAX reference with exact PyTorch forward semantics."""
    x = x.astype(jnp.float32)
    x = x / jnp.sqrt(jnp.mean(x * x, axis=1, keepdims=True) + EPS)
    for i in range(NUM_LAYERS):
        x = jnp.dot(x * scales[i], jnp.asarray(weights[i], jnp.float32).T,
                    precision=jax.lax.Precision.HIGHEST) + biases[i]
        if i < NUM_LAYERS - 1:
            x = jnp.maximum(x, 0.0)
    return x


def mapping_network_ref_bf16(x, w0, w_rest, b_slab, z_dim, w_dim):
    """Reference mirroring the kernel's precision (bf16 matmuls, f32 accum)."""
    K0, D = w0.shape
    xp = jnp.zeros((x.shape[0], K0), jnp.float32).at[:, :x.shape[1]].set(
        x.astype(jnp.float32))
    xp = xp * jax.lax.rsqrt(jnp.sum(xp * xp, axis=1, keepdims=True)
                            * (1.0 / z_dim) + EPS)
    xp = jnp.dot(xp.astype(jnp.bfloat16), w0,
                 preferred_element_type=jnp.float32) + b_slab[0]
    xp = jnp.maximum(xp, 0.0)
    for i in range(1, NUM_LAYERS):
        xp = jnp.dot(xp.astype(jnp.bfloat16), w_rest[i - 1],
                     preferred_element_type=jnp.float32) + b_slab[i]
        if i < NUM_LAYERS - 1:
            xp = jnp.maximum(xp, 0.0)
    return xp[:, :w_dim]


def make_params(key, z_dim, w_dim):
    """WSLinear params: weight ~ N(0,1), scale = sqrt(2/in).  The module inits
    bias to zero; small non-zero biases are used here so the bias path is
    exercised (forward semantics hold for any bias values)."""
    dims = [(z_dim, w_dim)] + [(w_dim, w_dim)] * (NUM_LAYERS - 1)
    weights, biases, scales = [], [], []
    for d_in, d_out in dims:
        key, kw, kb = jax.random.split(key, 3)
        weights.append(jax.random.normal(kw, (d_out, d_in), jnp.float32))
        biases.append(0.1 * jax.random.normal(kb, (d_out,), jnp.float32))
        scales.append((2.0 / d_in) ** 0.5)
    return weights, biases, scales


if __name__ == "__main__":
    key = jax.random.PRNGKey(0)

    # Case 1: aligned shapes (B % 8 == 0, dims multiple of 128) -> no wrapper
    #         pad, no output slice, 2 "parallel" grid steps.
    # Case 2: ragged shapes -> exercises the pad / slice path.
    cases = [(16, 128, 128), (10, 32, 96)]

    for (B, z_dim, w_dim) in cases:
        key, kx, kp = jax.random.split(key, 3)
        x = jax.random.normal(kx, (B, z_dim), jnp.float32)
        weights, biases, scales = make_params(kp, z_dim, w_dim)

        # One-time prep (fold scale, transpose, pad, stack, bf16 cast).
        w0, w_rest, b_slab = prepare_params(weights, biases, scales)

        out = mapping_network_pallas(x, w0, w_rest, b_slab, z_dim, w_dim)
        out = jax.block_until_ready(out)
        assert out.shape == (B, w_dim)

        # Exactness vs. a precision-matched (bf16-matmul) reference.
        ref_bf16 = mapping_network_ref_bf16(x, w0, w_rest, b_slab, z_dim, w_dim)
        assert jnp.allclose(out, ref_bf16, atol=2e-3, rtol=2e-3), \
            f"mismatch vs precision-matched reference (B={B})"

        # Sanity vs. the true f32 PyTorch-semantics reference (bf16 drift).
        ref_f32 = mapping_network_ref_f32(x, weights, biases, scales)
        assert jnp.allclose(out, ref_f32, atol=6e-2, rtol=6e-2), \
            f"mismatch vs f32 reference (B={B})"

    print("KERNEL_OK")
</pallas_src>

<mosaic_0001>
module attributes {stable_mosaic.version = 11 : i64} {
  func.func @_mapping_kernel(%arg0: i32, %arg1: memref<8x128xf32, #tpu.memory_space<vmem>>, %arg2: memref<128x128xbf16, #tpu.memory_space<vmem>>, %arg3: memref<7x128x128xbf16, #tpu.memory_space<vmem>>, %arg4: memref<8x1x128xf32, #tpu.memory_space<vmem>>, %arg5: memref<8x128xf32, #tpu.memory_space<vmem>>) attributes {dimension_semantics = [#tpu.dimension_semantics<parallel>], iteration_bounds = array<i64: 2>, scalar_prefetch = 0 : i64, scratch_operands = 0 : i64, tpu.core_type = #tpu.core_type<tc>, window_params = [{transform_indices = @transform_0, window_bounds = array<i64: 8, 128>}, {pipeline_mode = #tpu.pipeline_mode<synchronous>, transform_indices = @transform_1, window_bounds = array<i64: 128, 128>}, {pipeline_mode = #tpu.pipeline_mode<synchronous>, transform_indices = @transform_2, window_bounds = array<i64: 7, 128, 128>}, {pipeline_mode = #tpu.pipeline_mode<synchronous>, transform_indices = @transform_3, window_bounds = array<i64: 8, 1, 128>}, {transform_indices = @transform_4, window_bounds = array<i64: 8, 128>}]} {
    %c0 = arith.constant 0 : index
    %c0_0 = arith.constant 0 : index
    %0 = vector.load %arg1[%c0, %c0_0] : memref<8x128xf32, #tpu.memory_space<vmem>>, vector<8x128xf32>
    %1 = arith.mulf %0, %0 : vector<8x128xf32>
    %cst = arith.constant dense<0.000000e+00> : vector<8xf32>
    %2 = vector.multi_reduction <add>, %1, %cst [1] : vector<8x128xf32> to vector<8xf32>
    %3 = vector.shape_cast %2 : vector<8xf32> to vector<8x1xf32>
    %cst_1 = arith.constant 7.812500e-03 : f32
    %4 = vector.broadcast %cst_1 : f32 to vector<8x1xf32>
    %5 = arith.mulf %3, %4 : vector<8x1xf32>
    %cst_2 = arith.constant 9.99999993E-9 : f32
    %6 = vector.broadcast %cst_2 : f32 to vector<8x1xf32>
    %7 = arith.addf %5, %6 : vector<8x1xf32>
    %8 = math.rsqrt %7 : vector<8x1xf32>
    %9 = vector.broadcast %8 : vector<8x1xf32> to vector<8x128xf32>
    %10 = arith.mulf %0, %9 : vector<8x128xf32>
    %11 = arith.truncf %10 : vector<8x128xf32> to vector<8x128xbf16>
    %c0_3 = arith.constant 0 : index
    %c0_4 = arith.constant 0 : index
    %12 = vector.load %arg2[%c0_3, %c0_4] : memref<128x128xbf16, #tpu.memory_space<vmem>>, vector<128x128xbf16>
    %cst_5 = arith.constant dense<0.000000e+00> : vector<8x128xf32>
    %13 = tpu.matmul %11, %12, %cst_5 {dimension_numbers = #tpu.dot_dimension_numbers<[1], [0], [0], [1], [0, 0, 1, 1], [], []>} : vector<8x128xbf16>, vector<128x128xbf16>, vector<8x128xf32> -> vector<8x128xf32>
    %c0_6 = arith.constant 0 : index
    %c0_7 = arith.constant 0 : index
    %c0_8 = arith.constant 0 : index
    %14 = vector.load %arg4[%c0_6, %c0_7, %c0_8] : memref<8x1x128xf32, #tpu.memory_space<vmem>>, vector<1x1x128xf32>
    %15 = vector.shape_cast %14 : vector<1x1x128xf32> to vector<1x128xf32>
    %16 = vector.broadcast %15 : vector<1x128xf32> to vector<8x128xf32>
    %17 = arith.addf %13, %16 : vector<8x128xf32>
    %cst_9 = arith.constant 0.000000e+00 : f32
    %18 = vector.broadcast %cst_9 : f32 to vector<8x128xf32>
    %19 = arith.maximumf %17, %18 : vector<8x128xf32>
    %20 = arith.truncf %19 : vector<8x128xf32> to vector<8x128xbf16>
    %c0_10 = arith.constant 0 : index
    %c0_11 = arith.constant 0 : index
    %c0_12 = arith.constant 0 : index
    %21 = vector.load %arg3[%c0_10, %c0_11, %c0_12] : memref<7x128x128xbf16, #tpu.memory_space<vmem>>, vector<1x128x128xbf16>
    %22 = vector.shape_cast %21 : vector<1x128x128xbf16> to vector<128x128xbf16>
    %cst_13 = arith.constant dense<0.000000e+00> : vector<8x128xf32>
    %23 = tpu.matmul %20, %22, %cst_13 {dimension_numbers = #tpu.dot_dimension_numbers<[1], [0], [0], [1], [0, 0, 1, 1], [], []>} : vector<8x128xbf16>, vector<128x128xbf16>, vector<8x128xf32> -> vector<8x128xf32>
    %c1 = arith.constant 1 : index
    %c0_14 = arith.constant 0 : index
    %c0_15 = arith.constant 0 : index
    %24 = vector.load %arg4[%c1, %c0_14, %c0_15] : memref<8x1x128xf32, #tpu.memory_space<vmem>>, vector<1x1x128xf32>
    %25 = vector.shape_cast %24 : vector<1x1x128xf32> to vector<1x128xf32>
    %26 = vector.broadcast %25 : vector<1x128xf32> to vector<8x128xf32>
    %27 = arith.addf %23, %26 : vector<8x128xf32>
    %cst_16 = arith.constant 0.000000e+00 : f32
    %28 = vector.broadcast %cst_16 : f32 to vector<8x128xf32>
    %29 = arith.maximumf %27, %28 : vector<8x128xf32>
    %30 = arith.truncf %29 : vector<8x128xf32> to vector<8x128xbf16>
    %c1_17 = arith.constant 1 : index
    %c0_18 = arith.constant 0 : index
    %c0_19 = arith.constant 0 : index
    %31 = vector.load %arg3[%c1_17, %c0_18, %c0_19] : memref<7x128x128xbf16, #tpu.memory_space<vmem>>, vector<1x128x128xbf16>
    %32 = vector.shape_cast %31 : vector<1x128x128xbf16> to vector<128x128xbf16>
    %cst_20 = arith.constant dense<0.000000e+00> : vector<8x128xf32>
    %33 = tpu.matmul %30, %32, %cst_20 {dimension_numbers = #tpu.dot_dimension_numbers<[1], [0], [0], [1], [0, 0, 1, 1], [], []>} : vector<8x128xbf16>, vector<128x128xbf16>, vector<8x128xf32> -> vector<8x128xf32>
    %c2 = arith.constant 2 : index
    %c0_21 = arith.constant 0 : index
    %c0_22 = arith.constant 0 : index
    %34 = vector.load %arg4[%c2, %c0_21, %c0_22] : memref<8x1x128xf32, #tpu.memory_space<vmem>>, vector<1x1x128xf32>
    %35 = vector.shape_cast %34 : vector<1x1x128xf32> to vector<1x128xf32>
    %36 = vector.broadcast %35 : vector<1x128xf32> to vector<8x128xf32>
    %37 = arith.addf %33, %36 : vector<8x128xf32>
    %cst_23 = arith.constant 0.000000e+00 : f32
    %38 = vector.broadcast %cst_23 : f32 to vector<8x128xf32>
    %39 = arith.maximumf %37, %38 : vector<8x128xf32>
    %40 = arith.truncf %39 : vector<8x128xf32> to vector<8x128xbf16>
    %c2_24 = arith.constant 2 : index
    %c0_25 = arith.constant 0 : index
    %c0_26 = arith.constant 0 : index
    %41 = vector.load %arg3[%c2_24, %c0_25, %c0_26] : memref<7x128x128xbf16, #tpu.memory_space<vmem>>, vector<1x128x128xbf16>
    %42 = vector.shape_cast %41 : vector<1x128x128xbf16> to vector<128x128xbf16>
    %cst_27 = arith.constant dense<0.000000e+00> : vector<8x128xf32>
    %43 = tpu.matmul %40, %42, %cst_27 {dimension_numbers = #tpu.dot_dimension_numbers<[1], [0], [0], [1], [0, 0, 1, 1], [], []>} : vector<8x128xbf16>, vector<128x128xbf16>, vector<8x128xf32> -> vector<8x128xf32>
    %c3 = arith.constant 3 : index
    %c0_28 = arith.constant 0 : index
    %c0_29 = arith.constant 0 : index
    %44 = vector.load %arg4[%c3, %c0_28, %c0_29] : memref<8x1x128xf32, #tpu.memory_space<vmem>>, vector<1x1x128xf32>
    %45 = vector.shape_cast %44 : vector<1x1x128xf32> to vector<1x128xf32>
    %46 = vector.broadcast %45 : vector<1x128xf32> to vector<8x128xf32>
    %47 = arith.addf %43, %46 : vector<8x128xf32>
    %cst_30 = arith.constant 0.000000e+00 : f32
    %48 = vector.broadcast %cst_30 : f32 to vector<8x128xf32>
    %49 = arith.maximumf %47, %48 : vector<8x128xf32>
    %50 = arith.truncf %49 : vector<8x128xf32> to vector<8x128xbf16>
    %c3_31 = arith.constant 3 : index
    %c0_32 = arith.constant 0 : index
    %c0_33 = arith.constant 0 : index
    %51 = vector.load %arg3[%c3_31, %c0_32, %c0_33] : memref<7x128x128xbf16, #tpu.memory_space<vmem>>, vector<1x128x128xbf16>
    %52 = vector.shape_cast %51 : vector<1x128x128xbf16> to vector<128x128xbf16>
    %cst_34 = arith.constant dense<0.000000e+00> : vector<8x128xf32>
    %53 = tpu.matmul %50, %52, %cst_34 {dimension_numbers = #tpu.dot_dimension_numbers<[1], [0], [0], [1], [0, 0, 1, 1], [], []>} : vector<8x128xbf16>, vector<128x128xbf16>, vector<8x128xf32> -> vector<8x128xf32>
    %c4 = arith.constant 4 : index
    %c0_35 = arith.constant 0 : index
    %c0_36 = arith.constant 0 : index
    %54 = vector.load %arg4[%c4, %c0_35, %c0_36] : memref<8x1x128xf32, #tpu.memory_space<vmem>>, vector<1x1x128xf32>
    %55 = vector.shape_cast %54 : vector<1x1x128xf32> to vector<1x128xf32>
    %56 = vector.broadcast %55 : vector<1x128xf32> to vector<8x128xf32>
    %57 = arith.addf %53, %56 : vector<8x128xf32>
    %cst_37 = arith.constant 0.000000e+00 : f32
    %58 = vector.broadcast %cst_37 : f32 to vector<8x128xf32>
    %59 = arith.maximumf %57, %58 : vector<8x128xf32>
    %60 = arith.truncf %59 : vector<8x128xf32> to vector<8x128xbf16>
    %c4_38 = arith.constant 4 : index
    %c0_39 = arith.constant 0 : index
    %c0_40 = arith.constant 0 : index
    %61 = vector.load %arg3[%c4_38, %c0_39, %c0_40] : memref<7x128x128xbf16, #tpu.memory_space<vmem>>, vector<1x128x128xbf16>
    %62 = vector.shape_cast %61 : vector<1x128x128xbf16> to vector<128x128xbf16>
    %cst_41 = arith.constant dense<0.000000e+00> : vector<8x128xf32>
    %63 = tpu.matmul %60, %62, %cst_41 {dimension_numbers = #tpu.dot_dimension_numbers<[1], [0], [0], [1], [0, 0, 1, 1], [], []>} : vector<8x128xbf16>, vector<128x128xbf16>, vector<8x128xf32> -> vector<8x128xf32>
    %c5 = arith.constant 5 : index
    %c0_42 = arith.constant 0 : index
    %c0_43 = arith.constant 0 : index
    %64 = vector.load %arg4[%c5, %c0_42, %c0_43] : memref<8x1x128xf32, #tpu.memory_space<vmem>>, vector<1x1x128xf32>
    %65 = vector.shape_cast %64 : vector<1x1x128xf32> to vector<1x128xf32>
    %66 = vector.broadcast %65 : vector<1x128xf32> to vector<8x128xf32>
    %67 = arith.addf %63, %66 : vector<8x128xf32>
    %cst_44 = arith.constant 0.000000e+00 : f32
    %68 = vector.broadcast %cst_44 : f32 to vector<8x128xf32>
    %69 = arith.maximumf %67, %68 : vector<8x128xf32>
    %70 = arith.truncf %69 : vector<8x128xf32> to vector<8x128xbf16>
    %c5_45 = arith.constant 5 : index
    %c0_46 = arith.constant 0 : index
    %c0_47 = arith.constant 0 : index
    %71 = vector.load %arg3[%c5_45, %c0_46, %c0_47] : memref<7x128x128xbf16, #tpu.memory_space<vmem>>, vector<1x128x128xbf16>
    %72 = vector.shape_cast %71 : vector<1x128x128xbf16> to vector<128x128xbf16>
    %cst_48 = arith.constant dense<0.000000e+00> : vector<8x128xf32>
    %73 = tpu.matmul %70, %72, %cst_48 {dimension_numbers = #tpu.dot_dimension_numbers<[1], [0], [0], [1], [0, 0, 1, 1], [], []>} : vector<8x128xbf16>, vector<128x128xbf16>, vector<8x128xf32> -> vector<8x128xf32>
    %c6 = arith.constant 6 : index
    %c0_49 = arith.constant 0 : index
    %c0_50 = arith.constant 0 : index
    %74 = vector.load %arg4[%c6, %c0_49, %c0_50] : memref<8x1x128xf32, #tpu.memory_space<vmem>>, vector<1x1x128xf32>
    %75 = vector.shape_cast %74 : vector<1x1x128xf32> to vector<1x128xf32>
    %76 = vector.broadcast %75 : vector<1x128xf32> to vector<8x128xf32>
    %77 = arith.addf %73, %76 : vector<8x128xf32>
    %cst_51 = arith.constant 0.000000e+00 : f32
    %78 = vector.broadcast %cst_51 : f32 to vector<8x128xf32>
    %79 = arith.maximumf %77, %78 : vector<8x128xf32>
    %80 = arith.truncf %79 : vector<8x128xf32> to vector<8x128xbf16>
    %c6_52 = arith.constant 6 : index
    %c0_53 = arith.constant 0 : index
    %c0_54 = arith.constant 0 : index
    %81 = vector.load %arg3[%c6_52, %c0_53, %c0_54] : memref<7x128x128xbf16, #tpu.memory_space<vmem>>, vector<1x128x128xbf16>
    %82 = vector.shape_cast %81 : vector<1x128x128xbf16> to vector<128x128xbf16>
    %cst_55 = arith.constant dense<0.000000e+00> : vector<8x128xf32>
    %83 = tpu.matmul %80, %82, %cst_55 {dimension_numbers = #tpu.dot_dimension_numbers<[1], [0], [0], [1], [0, 0, 1, 1], [], []>} : vector<8x128xbf16>, vector<128x128xbf16>, vector<8x128xf32> -> vector<8x128xf32>
    %c7 = arith.constant 7 : index
    %c0_56 = arith.constant 0 : index
    %c0_57 = arith.constant 0 : index
    %84 = vector.load %arg4[%c7, %c0_56, %c0_57] : memref<8x1x128xf32, #tpu.memory_space<vmem>>, vector<1x1x128xf32>
    %85 = vector.shape_cast %84 : vector<1x1x128xf32> to vector<1x128xf32>
    %86 = vector.broadcast %85 : vector<1x128xf32> to vector<8x128xf32>
    %87 = arith.addf %83, %86 : vector<8x128xf32>
    %c0_58 = arith.constant 0 : index
    %c0_59 = arith.constant 0 : index
    %88 = vector.load %arg5[%c0_58, %c0_59] : memref<8x128xf32, #tpu.memory_space<vmem>>, vector<8x128xf32>
    tpu.vector_store %arg5[%c0_58, %c0_59], %87 {strides = array<i32>} : memref<8x128xf32, #tpu.memory_space<vmem>>, vector<8x128xf32>,
    return
  }
  func.func @transform_0(%arg0: i32) -> (i32, i32) {
    %c0_i32 = arith.constant 0 : i32
    %c0_i32_0 = arith.constant 0 : i32
    return %arg0, %c0_i32 : i32, i32
  }
  func.func @transform_1(%arg0: i32) -> (i32, i32) {
    %c0_i32 = arith.constant 0 : i32
    %c0_i32_0 = arith.constant 0 : i32
    %c0_i32_1 = arith.constant 0 : i32
    return %c0_i32, %c0_i32_0 : i32, i32
  }
  func.func @transform_2(%arg0: i32) -> (i32, i32, i32) {
    %c0_i32 = arith.constant 0 : i32
    %c0_i32_0 = arith.constant 0 : i32
    %c0_i32_1 = arith.constant 0 : i32
    %c0_i32_2 = arith.constant 0 : i32
    return %c0_i32, %c0_i32_0, %c0_i32_1 : i32, i32, i32
  }
  func.func @transform_3(%arg0: i32) -> (i32, i32, i32) {
    %c0_i32 = arith.constant 0 : i32
    %c0_i32_0 = arith.constant 0 : i32
    %c0_i32_1 = arith.constant 0 : i32
    %c0_i32_2 = arith.constant 0 : i32
    return %c0_i32, %c0_i32_0, %c0_i32_1 : i32, i32, i32
  }
  func.func @transform_4(%arg0: i32) -> (i32, i32) {
    %c0_i32 = arith.constant 0 : i32
    %c0_i32_0 = arith.constant 0 : i32
    return %arg0, %c0_i32 : i32, i32
  }
}

module attributes {stable_mosaic.version = 11 : i64} {
  func.func @_mapping_kernel(%arg0: i32, %arg1: memref<8x128xf32, #tpu.memory_space<vmem>>, %arg2: memref<128x128xbf16, #tpu.memory_space<vmem>>, %arg3: memref<7x128x128xbf16, #tpu.memory_space<vmem>>, %arg4: memref<8x1x128xf32, #tpu.memory_space<vmem>>, %arg5: memref<8x128xf32, #tpu.memory_space<vmem>>) attributes {dimension_semantics = [#tpu.dimension_semantics<parallel>], iteration_bounds = array<i64: 2>, scalar_prefetch = 0 : i64, scratch_operands = 0 : i64, tpu.core_type = #tpu.core_type<tc>, window_params = [{transform_indices = @transform_0, window_bounds = array<i64: 8, 128>}, {pipeline_mode = #tpu.pipeline_mode<synchronous>, transform_indices = @transform_1, window_bounds = array<i64: 128, 128>}, {pipeline_mode = #tpu.pipeline_mode<synchronous>, transform_indices = @transform_2, window_bounds = array<i64: 7, 128, 128>}, {pipeline_mode = #tpu.pipeline_mode<synchronous>, transform_indices = @transform_3, window_bounds = array<i64: 8, 1, 128>}, {transform_indices = @transform_4, window_bounds = array<i64: 8, 128>}]} {
    %c0 = arith.constant 0 : index
    %c0_0 = arith.constant 0 : index
    %0 = vector.load %arg1[%c0, %c0_0] : memref<8x128xf32, #tpu.memory_space<vmem>>, vector<8x128xf32>
    %1 = arith.mulf %0, %0 : vector<8x128xf32>
    %cst = arith.constant dense<0.000000e+00> : vector<8xf32>
    %2 = vector.multi_reduction <add>, %1, %cst [1] : vector<8x128xf32> to vector<8xf32>
    %3 = vector.shape_cast %2 : vector<8xf32> to vector<8x1xf32>
    %cst_1 = arith.constant 7.812500e-03 : f32
    %4 = vector.broadcast %cst_1 : f32 to vector<8x1xf32>
    %5 = arith.mulf %3, %4 : vector<8x1xf32>
    %cst_2 = arith.constant 9.99999993E-9 : f32
    %6 = vector.broadcast %cst_2 : f32 to vector<8x1xf32>
    %7 = arith.addf %5, %6 : vector<8x1xf32>
    %8 = math.rsqrt %7 : vector<8x1xf32>
    %9 = vector.broadcast %8 : vector<8x1xf32> to vector<8x128xf32>
    %10 = arith.mulf %0, %9 : vector<8x128xf32>
    %11 = arith.truncf %10 : vector<8x128xf32> to vector<8x128xbf16>
    %c0_3 = arith.constant 0 : index
    %c0_4 = arith.constant 0 : index
    %12 = vector.load %arg2[%c0_3, %c0_4] : memref<128x128xbf16, #tpu.memory_space<vmem>>, vector<128x128xbf16>
    %cst_5 = arith.constant dense<0.000000e+00> : vector<8x128xf32>
    %13 = tpu.matmul %11, %12, %cst_5 {dimension_numbers = #tpu.dot_dimension_numbers<[1], [0], [0], [1], [0, 0, 1, 1], [], []>} : vector<8x128xbf16>, vector<128x128xbf16>, vector<8x128xf32> -> vector<8x128xf32>
    %c0_6 = arith.constant 0 : index
    %c0_7 = arith.constant 0 : index
    %c0_8 = arith.constant 0 : index
    %14 = vector.load %arg4[%c0_6, %c0_7, %c0_8] : memref<8x1x128xf32, #tpu.memory_space<vmem>>, vector<1x1x128xf32>
    %15 = vector.shape_cast %14 : vector<1x1x128xf32> to vector<1x128xf32>
    %16 = vector.broadcast %15 : vector<1x128xf32> to vector<8x128xf32>
    %17 = arith.addf %13, %16 : vector<8x128xf32>
    %cst_9 = arith.constant 0.000000e+00 : f32
    %18 = vector.broadcast %cst_9 : f32 to vector<8x128xf32>
    %19 = arith.maximumf %17, %18 : vector<8x128xf32>
    %20 = arith.truncf %19 : vector<8x128xf32> to vector<8x128xbf16>
    %c0_10 = arith.constant 0 : index
    %c0_11 = arith.constant 0 : index
    %c0_12 = arith.constant 0 : index
    %21 = vector.load %arg3[%c0_10, %c0_11, %c0_12] : memref<7x128x128xbf16, #tpu.memory_space<vmem>>, vector<1x128x128xbf16>
    %22 = vector.shape_cast %21 : vector<1x128x128xbf16> to vector<128x128xbf16>
    %cst_13 = arith.constant dense<0.000000e+00> : vector<8x128xf32>
    %23 = tpu.matmul %20, %22, %cst_13 {dimension_numbers = #tpu.dot_dimension_numbers<[1], [0], [0], [1], [0, 0, 1, 1], [], []>} : vector<8x128xbf16>, vector<128x128xbf16>, vector<8x128xf32> -> vector<8x128xf32>
    %c1 = arith.constant 1 : index
    %c0_14 = arith.constant 0 : index
    %c0_15 = arith.constant 0 : index
    %24 = vector.load %arg4[%c1, %c0_14, %c0_15] : memref<8x1x128xf32, #tpu.memory_space<vmem>>, vector<1x1x128xf32>
    %25 = vector.shape_cast %24 : vector<1x1x128xf32> to vector<1x128xf32>
    %26 = vector.broadcast %25 : vector<1x128xf32> to vector<8x128xf32>
    %27 = arith.addf %23, %26 : vector<8x128xf32>
    %cst_16 = arith.constant 0.000000e+00 : f32
    %28 = vector.broadcast %cst_16 : f32 to vector<8x128xf32>
    %29 = arith.maximumf %27, %28 : vector<8x128xf32>
    %30 = arith.truncf %29 : vector<8x128xf32> to vector<8x128xbf16>
    %c1_17 = arith.constant 1 : index
    %c0_18 = arith.constant 0 : index
    %c0_19 = arith.constant 0 : index
    %31 = vector.load %arg3[%c1_17, %c0_18, %c0_19] : memref<7x128x128xbf16, #tpu.memory_space<vmem>>, vector<1x128x128xbf16>
    %32 = vector.shape_cast %31 : vector<1x128x128xbf16> to vector<128x128xbf16>
    %cst_20 = arith.constant dense<0.000000e+00> : vector<8x128xf32>
    %33 = tpu.matmul %30, %32, %cst_20 {dimension_numbers = #tpu.dot_dimension_numbers<[1], [0], [0], [1], [0, 0, 1, 1], [], []>} : vector<8x128xbf16>, vector<128x128xbf16>, vector<8x128xf32> -> vector<8x128xf32>
    %c2 = arith.constant 2 : index
    %c0_21 = arith.constant 0 : index
    %c0_22 = arith.constant 0 : index
    %34 = vector.load %arg4[%c2, %c0_21, %c0_22] : memref<8x1x128xf32, #tpu.memory_space<vmem>>, vector<1x1x128xf32>
    %35 = vector.shape_cast %34 : vector<1x1x128xf32> to vector<1x128xf32>
    %36 = vector.broadcast %35 : vector<1x128xf32> to vector<8x128xf32>
    %37 = arith.addf %33, %36 : vector<8x128xf32>
    %cst_23 = arith.constant 0.000000e+00 : f32
    %38 = vector.broadcast %cst_23 : f32 to vector<8x128xf32>
    %39 = arith.maximumf %37, %38 : vector<8x128xf32>
    %40 = arith.truncf %39 : vector<8x128xf32> to vector<8x128xbf16>
    %c2_24 = arith.constant 2 : index
    %c0_25 = arith.constant 0 : index
    %c0_26 = arith.constant 0 : index
    %41 = vector.load %arg3[%c2_24, %c0_25, %c0_26] : memref<7x128x128xbf16, #tpu.memory_space<vmem>>, vector<1x128x128xbf16>
    %42 = vector.shape_cast %41 : vector<1x128x128xbf16> to vector<128x128xbf16>
    %cst_27 = arith.constant dense<0.000000e+00> : vector<8x128xf32>
    %43 = tpu.matmul %40, %42, %cst_27 {dimension_numbers = #tpu.dot_dimension_numbers<[1], [0], [0], [1], [0, 0, 1, 1], [], []>} : vector<8x128xbf16>, vector<128x128xbf16>, vector<8x128xf32> -> vector<8x128xf32>
    %c3 = arith.constant 3 : index
    %c0_28 = arith.constant 0 : index
    %c0_29 = arith.constant 0 : index
    %44 = vector.load %arg4[%c3, %c0_28, %c0_29] : memref<8x1x128xf32, #tpu.memory_space<vmem>>, vector<1x1x128xf32>
    %45 = vector.shape_cast %44 : vector<1x1x128xf32> to vector<1x128xf32>
    %46 = vector.broadcast %45 : vector<1x128xf32> to vector<8x128xf32>
    %47 = arith.addf %43, %46 : vector<8x128xf32>
    %cst_30 = arith.constant 0.000000e+00 : f32
    %48 = vector.broadcast %cst_30 : f32 to vector<8x128xf32>
    %49 = arith.maximumf %47, %48 : vector<8x128xf32>
    %50 = arith.truncf %49 : vector<8x128xf32> to vector<8x128xbf16>
    %c3_31 = arith.constant 3 : index
    %c0_32 = arith.constant 0 : index
    %c0_33 = arith.constant 0 : index
    %51 = vector.load %arg3[%c3_31, %c0_32, %c0_33] : memref<7x128x128xbf16, #tpu.memory_space<vmem>>, vector<1x128x128xbf16>
    %52 = vector.shape_cast %51 : vector<1x128x128xbf16> to vector<128x128xbf16>
    %cst_34 = arith.constant dense<0.000000e+00> : vector<8x128xf32>
    %53 = tpu.matmul %50, %52, %cst_34 {dimension_numbers = #tpu.dot_dimension_numbers<[1], [0], [0], [1], [0, 0, 1, 1], [], []>} : vector<8x128xbf16>, vector<128x128xbf16>, vector<8x128xf32> -> vector<8x128xf32>
    %c4 = arith.constant 4 : index
    %c0_35 = arith.constant 0 : index
    %c0_36 = arith.constant 0 : index
    %54 = vector.load %arg4[%c4, %c0_35, %c0_36] : memref<8x1x128xf32, #tpu.memory_space<vmem>>, vector<1x1x128xf32>
    %55 = vector.shape_cast %54 : vector<1x1x128xf32> to vector<1x128xf32>
    %56 = vector.broadcast %55 : vector<1x128xf32> to vector<8x128xf32>
    %57 = arith.addf %53, %56 : vector<8x128xf32>
    %cst_37 = arith.constant 0.000000e+00 : f32
    %58 = vector.broadcast %cst_37 : f32 to vector<8x128xf32>
    %59 = arith.maximumf %57, %58 : vector<8x128xf32>
    %60 = arith.truncf %59 : vector<8x128xf32> to vector<8x128xbf16>
    %c4_38 = arith.constant 4 : index
    %c0_39 = arith.constant 0 : index
    %c0_40 = arith.constant 0 : index
    %61 = vector.load %arg3[%c4_38, %c0_39, %c0_40] : memref<7x128x128xbf16, #tpu.memory_space<vmem>>, vector<1x128x128xbf16>
    %62 = vector.shape_cast %61 : vector<1x128x128xbf16> to vector<128x128xbf16>
    %cst_41 = arith.constant dense<0.000000e+00> : vector<8x128xf32>
    %63 = tpu.matmul %60, %62, %cst_41 {dimension_numbers = #tpu.dot_dimension_numbers<[1], [0], [0], [1], [0, 0, 1, 1], [], []>} : vector<8x128xbf16>, vector<128x128xbf16>, vector<8x128xf32> -> vector<8x128xf32>
    %c5 = arith.constant 5 : index
    %c0_42 = arith.constant 0 : index
    %c0_43 = arith.constant 0 : index
    %64 = vector.load %arg4[%c5, %c0_42, %c0_43] : memref<8x1x128xf32, #tpu.memory_space<vmem>>, vector<1x1x128xf32>
    %65 = vector.shape_cast %64 : vector<1x1x128xf32> to vector<1x128xf32>
    %66 = vector.broadcast %65 : vector<1x128xf32> to vector<8x128xf32>
    %67 = arith.addf %63, %66 : vector<8x128xf32>
    %cst_44 = arith.constant 0.000000e+00 : f32
    %68 = vector.broadcast %cst_44 : f32 to vector<8x128xf32>
    %69 = arith.maximumf %67, %68 : vector<8x128xf32>
    %70 = arith.truncf %69 : vector<8x128xf32> to vector<8x128xbf16>
    %c5_45 = arith.constant 5 : index
    %c0_46 = arith.constant 0 : index
    %c0_47 = arith.constant 0 : index
    %71 = vector.load %arg3[%c5_45, %c0_46, %c0_47] : memref<7x128x128xbf16, #tpu.memory_space<vmem>>, vector<1x128x128xbf16>
    %72 = vector.shape_cast %71 : vector<1x128x128xbf16> to vector<128x128xbf16>
    %cst_48 = arith.constant dense<0.000000e+00> : vector<8x128xf32>
    %73 = tpu.matmul %70, %72, %cst_48 {dimension_numbers = #tpu.dot_dimension_numbers<[1], [0], [0], [1], [0, 0, 1, 1], [], []>} : vector<8x128xbf16>, vector<128x128xbf16>, vector<8x128xf32> -> vector<8x128xf32>
    %c6 = arith.constant 6 : index
    %c0_49 = arith.constant 0 : index
    %c0_50 = arith.constant 0 : index
    %74 = vector.load %arg4[%c6, %c0_49, %c0_50] : memref<8x1x128xf32, #tpu.memory_space<vmem>>, vector<1x1x128xf32>
    %75 = vector.shape_cast %74 : vector<1x1x128xf32> to vector<1x128xf32>
    %76 = vector.broadcast %75 : vector<1x128xf32> to vector<8x128xf32>
    %77 = arith.addf %73, %76 : vector<8x128xf32>
    %cst_51 = arith.constant 0.000000e+00 : f32
    %78 = vector.broadcast %cst_51 : f32 to vector<8x128xf32>
    %79 = arith.maximumf %77, %78 : vector<8x128xf32>
    %80 = arith.truncf %79 : vector<8x128xf32> to vector<8x128xbf16>
    %c6_52 = arith.constant 6 : index
    %c0_53 = arith.constant 0 : index
    %c0_54 = arith.constant 0 : index
    %81 = vector.load %arg3[%c6_52, %c0_53, %c0_54] : memref<7x128x128xbf16, #tpu.memory_space<vmem>>, vector<1x128x128xbf16>
    %82 = vector.shape_cast %81 : vector<1x128x128xbf16> to vector<128x128xbf16>
    %cst_55 = arith.constant dense<0.000000e+00> : vector<8x128xf32>
    %83 = tpu.matmul %80, %82, %cst_55 {dimension_numbers = #tpu.dot_dimension_numbers<[1], [0], [0], [1], [0, 0, 1, 1], [], []>} : vector<8x128xbf16>, vector<128x128xbf16>, vector<8x128xf32> -> vector<8x128xf32>
    %c7 = arith.constant 7 : index
    %c0_56 = arith.constant 0 : index
    %c0_57 = arith.constant 0 : index
    %84 = vector.load %arg4[%c7, %c0_56, %c0_57] : memref<8x1x128xf32, #tpu.memory_space<vmem>>, vector<1x1x128xf32>
    %85 = vector.shape_cast %84 : vector<1x1x128xf32> to vector<1x128xf32>
    %86 = vector.broadcast %85 : vector<1x128xf32> to vector<8x128xf32>
    %87 = arith.addf %83, %86 : vector<8x128xf32>
    %c0_58 = arith.constant 0 : index
    %c0_59 = arith.constant 0 : index
    %88 = vector.load %arg5[%c0_58, %c0_59] : memref<8x128xf32, #tpu.memory_space<vmem>>, vector<8x128xf32>
    tpu.vector_store %arg5[%c0_58, %c0_59], %87 {strides = array<i32>} : memref<8x128xf32, #tpu.memory_space<vmem>>, vector<8x128xf32>,
    return
  }
  func.func @transform_0(%arg0: i32) -> (i32, i32) {
    %c0_i32 = arith.constant 0 : i32
    %c0_i32_0 = arith.constant 0 : i32
    return %arg0, %c0_i32 : i32, i32
  }
  func.func @transform_1(%arg0: i32) -> (i32, i32) {
    %c0_i32 = arith.constant 0 : i32
    %c0_i32_0 = arith.constant 0 : i32
    %c0_i32_1 = arith.constant 0 : i32
    return %c0_i32, %c0_i32_0 : i32, i32
  }
  func.func @transform_2(%arg0: i32) -> (i32, i32, i32) {
    %c0_i32 = arith.constant 0 : i32
    %c0_i32_0 = arith.constant 0 : i32
    %c0_i32_1 = arith.constant 0 : i32
    %c0_i32_2 = arith.constant 0 : i32
    return %c0_i32, %c0_i32_0, %c0_i32_1 : i32, i32, i32
  }
  func.func @transform_3(%arg0: i32) -> (i32, i32, i32) {
    %c0_i32 = arith.constant 0 : i32
    %c0_i32_0 = arith.constant 0 : i32
    %c0_i32_1 = arith.constant 0 : i32
    %c0_i32_2 = arith.constant 0 : i32
    return %c0_i32, %c0_i32_0, %c0_i32_1 : i32, i32, i32
  }
  func.func @transform_4(%arg0: i32) -> (i32, i32) {
    %c0_i32 = arith.constant 0 : i32
    %c0_i32_0 = arith.constant 0 : i32
    return %arg0, %c0_i32 : i32, i32
  }
}

</mosaic_0001>

<bundles_post_ra>
// kernel: tpu_custom_call.1
= control target key start
LH: loop header
LB: loop body
LE: loop exit
PB: predicated region body
PF: predicated region fallthrough
CT: control target
= control target key end

     0   :  { %9 = vsyncpa [#allocation3], 0  ;;  %s2263_s0 = inlined_call_operand.hbm [shape: f32[16,128], index: 0, kind: input, shape index: {}]   ;;  %s2264_s1 = inlined_call_operand.hbm [shape: bf16[128,128], index: 1, kind: input, shape index: {}]   ;;  %s2265_s2 = inlined_call_operand.hbm [shape: bf16[7,128,128], index: 2, kind: input, shape index: {}]   ;;  %s2266_s3 = inlined_call_operand.vmem [shape: f32[8,1,128], index: 3, kind: input, shape index: {}]   ;;  %s2267_s4 = inlined_call_operand.hbm [shape: f32[16,128], index: 4, kind: output, shape index: {}]  }
   0x1   :  { %11 = vsyncpa [#allocation3 + $0x1], 0 }
   0x2   :  { %12 = vsyncpa [#allocation6], 0 }
   0x3   :  { %13 = vsyncpa [#allocation4], 0 }
   0x4   :  { %15 = vsyncpa [#allocation4 + $0x1], 0  ;;  %s1926_s15 = smov 0   ;;  %s1928_s16 = smov 0  }
   0x5   :  { %s1930_s17 = smov 0   ;;  %s1932_s18 = smov 0  }
   0x6 LB: > { %s1947_s19 = sadd.s32 4294967295, %s1891_s18   ;;  %s1271_s20 = sadd.s32 4294967294, %s1891_s18   ;;  %s1891_s18 = sphi %s1932_s18, %s2287_s18   ;;  %s1887_s17 = sphi %s1930_s17, %s2286_s17   ;;  %s1883_s16 = sphi %s1928_s16, %s2285_s16   ;;  %s1879_s15 = sphi %s1926_s15, %s2284_s15  }
   0x7   : > { %p41_p0 = scmp.ne.s32.totalorder %s1883_s16, %s1879_s15  ;;  %p2268_p1 = scmp.eq.s32.totalorder %s1947_s19, 0 }
   0x8   : > { %p134_p3 = scmp.eq.s32.totalorder %s1271_s20, 1  ;;  %p1272_p5 = scmp.ge.s32.totalorder %s1891_s18, 1 }
   0x9   : > { %p1956_p4 = por %p2268_p1, %p41_p0  ;;  %p141_p7 = scmp.lt.s32.totalorder %s1891_s18, 3 }
   0xa   : > { %p1961_p6 = por %p134_p3, %p41_p0  ;;  %s1893_s24 = smov [#allocation5]  }
   0xb   : > { %s2271_s21 = scalar_select %p1956_p4, 1, 0 }
   0xc   : > { %s2272_s22 = scalar_select %p1961_p6, 1, 0 }
   0xd   : > { %p1966_p8 = pnand %p1272_p5, %p141_p7  ;;  %s153_s25 = sshll.u32 %s1893_s24, 4  ;;  %s1970_s25 = int_to_ptr.vmem [resolvable:$true] %s153_s25 }
   0xe   : > { %s1894_s27 = smov [#allocation7]   ;;  %s1735_s5 = scalar_lea.hbm %s2264_s1, 1024 }
   0xf   : > { %p1610_p9 = pneg %p1966_p8  ;;  %s166_s28 = sshll.u32 %s1894_s27, 4  ;;  %s1981_s28 = int_to_ptr.vmem [resolvable:$true] %s166_s28 }
  0x10   : > { %p1736_p12 = scmp.ne.s32.totalorder %s2264_s1, %s1735_s5  ;;  %p1742_p5 = scmp.lt.u32.totalorder %s1735_s5, %s2264_s1 }
  0x11   : > { %p1977_p11 = pnand %p1610_p9, %p2268_p1 }
  0x13   : > { %p1737_p13 = pneg %p1977_p11 }
  0x15   : > { %p1738_p0 = pnand %p1737_p13, %p1736_p12 }
  0x17   : > { %p1739_p3 = pneg %p1738_p0 }
  0x19   : > { %p1744_p7 = pnand %p1742_p5, %p1739_p3 }
  0x1b   : > { %1747 = shalt.err (!%p1744_p7)
}
  0x1c   : > { %s1748_s10 = scalar_lea.vmem %s1970_s25, 1024  ;;  %p1756_p2 = scmp.lt.s32.totalorder %s1970_s25, %s1970_s25 }
  0x1d   : > { %p1749_p9 = scmp.ne.s32.totalorder %s1970_s25, %s1748_s10  ;;  %p1757_p12 = scmp.lt.s32.totalorder %s1748_s10, %s1748_s10 }
  0x1f   : > { %p1751_p10 = pnand %p1749_p9, %p1737_p13  ;;  %p1758_p0 = por %p1757_p12, %p1756_p2 }
  0x21   : > { %p1752_p1 = pneg %p1751_p10 }
  0x23   : > { %p1759_p6 = pnand %p1758_p0, %p1752_p1 }
  0x25   : > { %1762 = shalt.err (!%p1759_p6)
}
  0x26   : > { %s1895_s11 = smov 64   ;;  %s1896_s12 = smov 4  }
  0x27   : > { %1613 = dma.hbm_to_vmem [thread:$0]  (!%p1977_p11), %s2264_s1, 1024, %s1970_s25, [#allocation6], %s1895_s11, %s1895_s11, %s1896_s12  }
  0x28   : > { %s1763_s27 = scalar_lea.hbm %s2265_s2, 7168 }
  0x29   : > { %p1764_p2 = scmp.ne.s32.totalorder %s2265_s2, %s1763_s27  ;;  %p1770_p10 = scmp.lt.u32.totalorder %s1763_s27, %s2265_s2 }
  0x2b   : > { %p1766_p1 = pnand %p1764_p2, %p1737_p13 }
  0x2d   : > { %p1767_p6 = pneg %p1766_p1 }
  0x2f   : > { %p1772_p3 = pnand %p1770_p10, %p1767_p6 }
  0x31   : > { %1775 = shalt.err (!%p1772_p3)
}
  0x32   : > { %s1776_s25 = scalar_lea.vmem %s1981_s28, 7168  ;;  %p1784_p12 = scmp.lt.s32.totalorder %s1981_s28, %s1981_s28 }
  0x33   : > { %p1777_p5 = scmp.ne.s32.totalorder %s1981_s28, %s1776_s25  ;;  %p1785_p0 = scmp.lt.s32.totalorder %s1776_s25, %s1776_s25 }
  0x35   : > { %p1779_p7 = pnand %p1777_p5, %p1737_p13  ;;  %p1786_p2 = por %p1785_p0, %p1784_p12 }
  0x37   : > { %p1780_p9 = pneg %p1779_p7 }
  0x39   : > { %p1787_p1 = pnand %p1786_p2, %p1780_p9 }
  0x3b   : > { %1790 = shalt.err (!%p1787_p1)
}
  0x3c   : > { %1616 = dma.hbm_to_vmem [thread:$0]  (!%p1977_p11), %s2265_s2, 7168, %s1981_s28, [#allocation6], %s1895_s11, %s1895_s11, %s1896_s12  }
  0x3d   : > { %s2036_s9 = sadd.s32 1, %s1891_s18   ;;  %s28_s26 = sadd.s32 1, %s1887_s17 }
  0x3e   : > { %s25_s10 = ssub.s32 %s1891_s18, %s2036_s9  ;;  %p35_p13 = scmp.ne.s32.totalorder %s1887_s17, %s1883_s16 }
  0x3f   : > { %p26_p6 = scmp.eq.s32.totalorder %s25_s10, 0  ;;  %p36_p10 = scmp.eq.s32.totalorder %s1891_s18, 0 }
  0x40   : > { %p2275_p3 = scmp.eq.s32.totalorder %s1947_s19, 1  ;;  %p1627_p7 = scmp.lt.s32.totalorder %s1891_s18, 2 }
  0x41   : > { %s2052_s14 = scalar_select %p26_p6, %s1887_s17, %s28_s26  }
  0x42   : > { %p2046_p5 = por %p2275_p3, %p35_p13  ;;  %p37_p9 = por %p36_p10, %p35_p13 }
  0x43   : > { %s183_s20 = sand.u32 1, %s1887_s17   ;;  %s1277_s28 = sshll.u32 %s1891_s18, 7 }
  0x44   : > { %s2276_s13 = scalar_select %p2046_p5, 1, 0 }
  0x45   : > { %s1276_s24 = sshll.u32 %s183_s20, 3  ;;  %s2059_s27 = scalar_lea.hbm %s2263_s0, %s1277_s28 }
  0x46   : > { %s187_s29 = scalar_lea.vmem [#allocation2], %s1276_s24  ;;  %p2063_p11 = pnand %p1627_p7, %p37_p9 }
  0x47   : > { %s194_s30 = sshll.u32 %s187_s29, 4  ;;  %s184_s6 = scalar_lea.sflag [#allocation3], %s183_s20  ;;  %s2061_s30 = int_to_ptr.vmem [resolvable:$true] %s194_s30 }
  0x48   : > { %s1791_s25 = scalar_lea.hbm %s2059_s27, 128  ;;  %p1793_p0 = pneg %p2063_p11 }
  0x49   : > { %p1792_p12 = scmp.ne.s32.totalorder %s2059_s27, %s1791_s25  ;;  %s1796_s26 = scalar_lea.hbm %s2263_s0, 256 }
  0x4a   : > { %p1797_p13 = scmp.lt.u32.totalorder %s2059_s27, %s2263_s0  ;;  %p1798_p6 = scmp.lt.u32.totalorder %s1796_s26, %s1791_s25 }
  0x4b   : > { %p1794_p2 = pnand %p1793_p0, %p1792_p12  ;;  %p1800_p3 = scmp.lt.u32.totalorder %s1791_s25, %s2059_s27 }
  0x4c   : > { %p1799_p10 = por %p1798_p6, %p1797_p13 }
  0x4d   : > { %p1795_p1 = pneg %p1794_p2 }
  0x4e   : > { %p1801_p7 = por %p1800_p3, %p1799_p10 }
  0x50   : > { %p1802_p9 = pnand %p1801_p7, %p1795_p1 }
  0x52   : > { %1805 = shalt.err (!%p1802_p9)
}
  0x53   : > { %s1806_s20 = scalar_lea.vmem %s2061_s30, 128  ;;  %s1897_s28 = smov [#allocation2]  }
  0x54   : > { %p1807_p12 = scmp.ne.s32.totalorder %s2061_s30, %s1806_s20  ;;  %s1811_s11 = sshll.u32 %s1897_s28, 4  ;;  %s1812_s11 = int_to_ptr.vmem [resolvable:$false] %s1811_s11 }
  0x55   : > { %s1813_s12 = scalar_lea.vmem %s1812_s11, 256  ;;  %p1814_p4 = scmp.lt.s32.totalorder %s2061_s30, %s1812_s11 }
  0x56   : > { %p1809_p2 = pnand %p1807_p12, %p1793_p0  ;;  %p1815_p13 = scmp.lt.s32.totalorder %s1813_s12, %s1806_s20 }
  0x58   : > { %p1810_p5 = pneg %p1809_p2  ;;  %p1816_p6 = por %p1815_p13, %p1814_p4 }
  0x5a   : > { %p1817_p10 = pnand %p1816_p6, %p1810_p5 }
  0x5c   : > { %1820 = shalt.err (!%p1817_p10)
}
  0x5d   : > { %1620 = dma.hbm_to_vmem [thread:$0]  (!%p2063_p11), %s2059_s27, 128, %s2061_s30, %s184_s6  }
  0x5e   : > { %203 = sbr.rel (%p1966_p8) target bundleno = 2023 (0x7e7), region = 36  ;;  %s2095_s29 = sand.u32 (!%p1966_p8), 1, %s1883_s16  }
  0x5f   : > { %s1279_s25 = sshll.u32 (!%p1966_p8), %s2095_s29, 3  ;;  %s206_s7 = scalar_lea.sflag (!%p1966_p8), [#allocation3], %s2095_s29 }
  0x60   : > { %s209_s8 = scalar_lea.vmem (!%p1966_p8), [#allocation2], %s1279_s25  ;;  %p2278_p4 = scmp.ne.s32.totalorder (!%p1966_p8), %s2271_s21, 0 }
  0x65   : > { %1866 = dma.done.wait (%p2278_p4), %s206_s7, 128  }
  0x66   : > { %1868 = vsyncadd (%p2278_p4), %s206_s7, 4294967168  ;;  %p2279_p5 = scmp.eq.s32.totalorder %s1947_s19, 0 }
  0x68   : > { %1870 = dma.done.wait (%p2279_p5), [#allocation6], 8192   ;;  %p2280_p8 = pmov %p2279_p5 }
  0x69   : > { %v1898_v0 = vmov 0.0   ;;  %v243_v1 = vld [vmem:[%s209_s8] sm:$0xff]  ;;  %v1669_v3 = vld [vmem:[#allocation5] sm:$0xff]   ;;  %v1670_v4 = vld [vmem:[#allocation5 + $0x8] sm:$0xff]   ;;  %vm1899_vm0 = vmmov 0   ;;  %s1363_s23 = sshll.u32 %s1947_s19, 7 }
  0x6a   : > { %1872 = vsyncadd (%p2280_p8), [#allocation6], 4294959104  ;;  %1438 = vmatprep.subr.bf16.mxu0 %v1898_v0  ;;  %1458 = vmatprep.subr.bf16.mxu1 %v1898_v0  ;;  %v244_v2 = vmul.f32 %v243_v1, %v243_v1  ;;  %v1671_v5 = vld [vmem:[#allocation5 + $0x10] sm:$0xff]   ;;  %v1672_v6 = vld [vmem:[#allocation5 + $0x18] sm:$0xff]   ;;  %s241_s27 = scalar_lea.vmem [#allocation8], %s1279_s25  ;;  %s2219_s26 = scalar_lea.hbm %s2267_s4, %s1363_s23 }
  0x6b   : > { %1439 = vmatpush3.bf16.msra.mxu0 %v1669_v3  ;;  %v1673_v7 = vld [vmem:[#allocation5 + $0x20] sm:$0xff]   ;;  %v1674_v8 = vld [vmem:[#allocation5 + $0x28] sm:$0xff]   ;;  %1454 = vmatprep.mubr.msk.bf16.mxu0 %vm1899_vm0, %v1898_v0  ;;  %v1675_v9 = vld [vmem:[#allocation5 + $0x30] sm:$0xff]   ;;  %s1182_s30 = sshll.u32 %s241_s27, 4  ;;  %s1169_s19 = scalar_lea.sflag [#allocation4], %s2095_s29  ;;  %s2221_s30 = int_to_ptr.vmem [resolvable:$true] %s1182_s30 }
  0x6c   : > { %245 = vadd.xlane.f32.xlu0 %v244_v2  ;;  %1440 = vmatprep.subr.bf16.mxu0 %v1898_v0  ;;  %v1676_v10 = vld [vmem:[#allocation5 + $0x38] sm:$0xff]   ;;  %v1677_v11 = vld [vmem:[#allocation7] sm:$0xff]   ;;  %v1678_v12 = vld [vmem:[#allocation7 + $0x8] sm:$0xff]   ;;  %s1821_s10 = scalar_lea.vmem %s2221_s30, 128  ;;  %p2281_p0 = scmp.ne.s32.totalorder %s2276_s13, 0 }
  0x6d   : > { %1474 = vmatprep.mubr.msk.bf16.mxu1 %vm1899_vm0, %v1898_v0  ;;  %1459 = vmatpush3.bf16.msra.mxu1 %v1677_v11  ;;  %v1679_v13 = vld [vmem:[#allocation7 + $0x10] sm:$0xff]   ;;  %v1680_v14 = vld [vmem:[#allocation7 + $0x18] sm:$0xff]   ;;  %v1681_v15 = vld [vmem:[#allocation7 + $0x20] sm:$0xff]   ;;  %p1822_p11 = scmp.ne.s32.totalorder %s2221_s30, %s1821_s10  ;;  %s1900_s25 = smov [#allocation8]  }
  0x6e   : > { %1460 = vmatprep.subr.bf16.mxu1 %v1898_v0  ;;  %v1682_v16 = vld [vmem:[#allocation7 + $0x28] sm:$0xff]   ;;  %v1683_v23 = vld [vmem:[#allocation7 + $0x30] sm:$0xff]   ;;  %v1684_v24 = vld [vmem:[#allocation7 + $0x38] sm:$0xff]   ;;  %s1825_s24 = sshll.u32 %s1900_s25, 4  ;;  %s1826_s24 = int_to_ptr.vmem [resolvable:$false] %s1825_s24 }
  0x6f   : > { %1441 = vmatpush3.bf16.msra.mxu0 %v1670_v4  ;;  %v1685_v25 = vld [vmem:[#allocation7 + $0x40] sm:$0xff]   ;;  %v1686_v26 = vld [vmem:[#allocation7 + $0x48] sm:$0xff]   ;;  %v1687_v27 = vld [vmem:[#allocation7 + $0x50] sm:$0xff]   ;;  %p1823_p1 = pnand %p1822_p11, %p2281_p0  ;;  %s1827_s20 = scalar_lea.vmem %s1826_s24, 256 }
  0x70   : > { %1442 = vmatprep.subr.bf16.mxu0 %v1898_v0  ;;  %v1688_v28 = vld [vmem:[#allocation7 + $0x58] sm:$0xff]   ;;  %v1689_v29 = vld [vmem:[#allocation7 + $0x60] sm:$0xff]   ;;  %v1690_v30 = vld [vmem:[#allocation7 + $0x68] sm:$0xff]   ;;  %p1828_p7 = scmp.lt.s32.totalorder %s2221_s30, %s1826_s24  ;;  %p1829_p9 = scmp.lt.s32.totalorder %s1827_s20, %s1821_s10 }
  0x71   : > { %1461 = vmatpush3.bf16.msra.mxu1 %v1678_v12  ;;  %v1283_v31 = vld [vmem:[%s2266_s3] ss:$0 sm:$0xff]  ;;  %v1692_v40 = vld [vmem:[#allocation7 + $0x78] sm:$0xff]   ;;  %v1693_v41 = vld [vmem:[#allocation7 + $0x80] sm:$0xff]   ;;  %p1824_p3 = pneg %p1823_p1 }
  0x72   : > { %1462 = vmatprep.subr.bf16.mxu1 %v1898_v0  ;;  %v1691_v39 = vld [vmem:[#allocation7 + $0x70] sm:$0xff]   ;;  %v1694_v42 = vld [vmem:[#allocation7 + $0x88] sm:$0xff]   ;;  %v1696_v44 = vld [vmem:[#allocation7 + $0x98] sm:$0xff]   ;;  %p1830_p12 = por %p1829_p9, %p1828_p7 }
  0x73   : > { %1443 = vmatpush3.bf16.msra.mxu0 %v1671_v5  ;;  %v1695_v43 = vld [vmem:[#allocation7 + $0x90] sm:$0xff]   ;;  %v1697_v45 = vld [vmem:[#allocation7 + $0xa0] sm:$0xff]   ;;  %v1698_v46 = vld [vmem:[#allocation7 + $0xa8] sm:$0xff]  }
  0x74   : > { %1444 = vmatprep.subr.bf16.mxu0 %v1898_v0  ;;  %v1293_v47 = vld [vmem:[%s2266_s3 + $0x1] ss:$0 sm:$0xff]  ;;  %v1700_v56 = vld [vmem:[#allocation7 + $0xb8] sm:$0xff]   ;;  %v1701_v57 = vld [vmem:[#allocation7 + $0xc0] sm:$0xff]   ;;  %p1831_p2 = pnand %p1830_p12, %p1824_p3 }
  0x75   : > { %1463 = vmatpush3.bf16.msra.mxu1 %v1679_v13  ;;  %v1699_v55 = vld [vmem:[#allocation7 + $0xb0] sm:$0xff]   ;;  %v1702_v58 = vld [vmem:[#allocation7 + $0xc8] sm:$0xff]   ;;  %v1704_v60 = vld [vmem:[#allocation7 + $0xd8] sm:$0xff]  }
  0x76   : > { %1464 = vmatprep.subr.bf16.mxu1 %v1898_v0  ;;  %v1703_v59 = vld [vmem:[#allocation7 + $0xd0] sm:$0xff]   ;;  %v1705_v61 = vld [vmem:[#allocation7 + $0xe0] sm:$0xff]   ;;  %v1706_v62 = vld [vmem:[#allocation7 + $0xe8] sm:$0xff]  }
  0x77   : > { %1445 = vmatpush3.bf16.msra.mxu0 %v1672_v6  ;;  %v1303_v63 = vld [vmem:[%s2266_s3 + $0x2] ss:$0 sm:$0xff]  ;;  %v1710_v11 = vld [vmem:[#allocation7 + $0x108] sm:$0xff]   ;;  %v1712_v13 = vld [vmem:[#allocation7 + $0x118] sm:$0xff]  }
  0x78   : > { %1446 = vmatprep.subr.bf16.mxu0 %v1898_v0  ;;  %v1711_v12 = vld [vmem:[#allocation7 + $0x110] sm:$0xff]  }
  0x79   : > { %1465 = vmatpush3.bf16.msra.mxu1 %v1680_v14  ;;  %v1713_v14 = vld [vmem:[#allocation7 + $0x120] sm:$0xff]  }
  0x7a   : > { %1466 = vmatprep.subr.bf16.mxu1 %v1898_v0 }
  0x7b   : > { %1447 = vmatpush3.bf16.msra.mxu0 %v1673_v7 }
  0x7c   : > { %1448 = vmatprep.subr.bf16.mxu0 %v1898_v0 }
  0x7d   : > { %1467 = vmatpush3.bf16.msra.mxu1 %v1681_v15  ;;  %v1714_v15 = vld [vmem:[#allocation7 + $0x128] sm:$0xff]  }
  0x7e   : > { %1468 = vmatprep.subr.bf16.mxu1 %v1898_v0 }
  0x7f   : > { %1449 = vmatpush3.bf16.msra.mxu0 %v1674_v8  ;;  %v1707_v8 = vld [vmem:[#allocation7 + $0xf0] sm:$0xff]  }
  0x80   : > { %1450 = vmatprep.subr.bf16.mxu0 %v1898_v0 }
  0x81   : > { %1469 = vmatpush3.bf16.msra.mxu1 %v1682_v16  ;;  %v1313_v16 = vld [vmem:[%s2266_s3 + $0x3] ss:$0 sm:$0xff] }
  0x82   : > { %1470 = vmatprep.subr.bf16.mxu1 %v1898_v0 }
  0x83   : > { %1451 = vmatpush3.bf16.msra.mxu0 %v1675_v9  ;;  %v1708_v9 = vld [vmem:[#allocation7 + $0xf8] sm:$0xff]  }
  0x84   : > { %1452 = vmatprep.subr.bf16.mxu0 %v1898_v0 }
  0x85   : > { %1471 = vmatpush3.bf16.msra.mxu1 %v1683_v23 }
  0x86   : > { %1472 = vmatprep.subr.bf16.mxu1 %v1898_v0 }
  0x87   : > { %1453 = vmatpush3.bf16.msra.mxu0 %v1676_v10  ;;  %v1709_v10 = vld [vmem:[#allocation7 + $0x100] sm:$0xff]  }
  0x88   : > { %1478 = vmatprep.subr.bf16.mxu0 %v1898_v0 }
  0x89   : > { %1473 = vmatpush3.bf16.msra.mxu1 %v1684_v24  ;;  %v1715_v24 = vld [vmem:[#allocation7 + $0x130] sm:$0xff]  }
  0x8a   : > { %1498 = vmatprep.subr.bf16.mxu1 %v1898_v0 }
  0xf9   : > { %v246_v17 = vpop.xlane.xlu0 %245 }
  0xfa   : > { %v247_v18 = vmul.f32 0.0078125, %v246_v17 }
  0xfc   : > { %v248_v19 = vadd.f32 1e-08, %v247_v18 }
  0xfe   : > { %1733 = vrsqrt.f32 %v248_v19 }
 0x108   : > { %v1734_v20 = vpop.eup %1733 }
 0x109   : > { %v250_v21 = vmul.f32 %v1734_v20, %v243_v1 }
 0x10b   : > { %v251_v22 = vpack.c.bf16 %v250_v21, %v250_v21 }
 0x10d   : > { %1455 = vmatmul.mubr.bf16.vlgmr.msra.gmra.mrb[0].mxu0 %v251_v22 }
 0x10e   : > { %1494 = vmatprep.mubr.msk.bf16.mxu0 %vm1899_vm0, %v1898_v0  ;;  %1479 = vmatpush3.bf16.msra.mxu0 %v1685_v25  ;;  %v1716_v25 = vld [vmem:[#allocation7 + $0x138] sm:$0xff]  }
 0x10f   : > { %1480 = vmatprep.subr.bf16.mxu0 %v1898_v0 }
 0x112   : > { %1481 = vmatpush3.bf16.msra.mxu0 %v1686_v26  ;;  %v1717_v26 = vld [vmem:[#allocation7 + $0x140] sm:$0xff]  }
 0x113   : > { %1482 = vmatprep.subr.bf16.mxu0 %v1898_v0 }
 0x116   : > { %1483 = vmatpush3.bf16.msra.mxu0 %v1687_v27  ;;  %v1718_v27 = vld [vmem:[#allocation7 + $0x148] sm:$0xff]  }
 0x117   : > { %1484 = vmatprep.subr.bf16.mxu0 %v1898_v0 }
 0x11a   : > { %1485 = vmatpush3.bf16.msra.mxu0 %v1688_v28  ;;  %v1719_v28 = vld [vmem:[#allocation7 + $0x150] sm:$0xff]  }
 0x11b   : > { %1486 = vmatprep.subr.bf16.mxu0 %v1898_v0 }
 0x11e   : > { %1487 = vmatpush3.bf16.msra.mxu0 %v1689_v29  ;;  %v1720_v29 = vld [vmem:[#allocation7 + $0x158] sm:$0xff]  }
 0x11f   : > { %1488 = vmatprep.subr.bf16.mxu0 %v1898_v0 }
 0x122   : > { %1489 = vmatpush3.bf16.msra.mxu0 %v1690_v30  ;;  %v1721_v30 = vld [vmem:[#allocation7 + $0x160] sm:$0xff]  }
 0x123   : > { %1490 = vmatprep.subr.bf16.mxu0 %v1898_v0 }
 0x126   : > { %1491 = vmatpush3.bf16.msra.mxu0 %v1691_v39 }
 0x127   : > { %1492 = vmatprep.subr.bf16.mxu0 %v1898_v0 }
 0x12a   : > { %1493 = vmatpush3.bf16.msra.mxu0 %v1692_v40  ;;  %v1723_v40 = vld [vmem:[#allocation7 + $0x170] sm:$0xff]  }
 0x12b   : > { %1518 = vmatprep.subr.bf16.mxu0 %v1898_v0 }
 0x1e0   : > { %v357_v32 = vpop.f32.mrb[0].mxu0 }
 0x1e1   : > { %v358_v33 = vadd.f32 %v1283_v31, %v357_v32  ;;  %v1456_v34 = vpop.f32.mrb[1].mxu0  ;;  %v1722_v31 = vld [vmem:[#allocation7 + $0x168] sm:$0xff]   ;;  %v1323_v32 = vld [vmem:[%s2266_s3 + $0x4] ss:$0 sm:$0xff] }
 0x1e2   : > { %v360_v35 = vpop.f32.mrb[2].mxu0 }
 0x1e3   : > { %v363_v36 = vmax.f32 %v358_v33, 0.0  ;;  %v1457_v37 = vpop.f32.mrb[3].mxu0 }
 0x1e5   : > { %v364_v38 = vpack.c.bf16 %v363_v36, %v363_v36 }
 0x1e7   : > { %1475 = vmatmul.mubr.bf16.vlgmr.msra.gmra.mrb[0].mxu1 %v364_v38 }
 0x1e8   : > { %1514 = vmatprep.mubr.msk.bf16.mxu1 %vm1899_vm0, %v1898_v0  ;;  %1499 = vmatpush3.bf16.msra.mxu1 %v1693_v41  ;;  %v1724_v41 = vld [vmem:[#allocation7 + $0x178] sm:$0xff]  }
 0x1e9   : > { %1500 = vmatprep.subr.bf16.mxu1 %v1898_v0 }
 0x1ec   : > { %1501 = vmatpush3.bf16.msra.mxu1 %v1694_v42  ;;  %v1725_v42 = vld [vmem:[#allocation7 + $0x180] sm:$0xff]  }
 0x1ed   : > { %1502 = vmatprep.subr.bf16.mxu1 %v1898_v0 }
 0x1f0   : > { %1503 = vmatpush3.bf16.msra.mxu1 %v1695_v43  ;;  %v1726_v43 = vld [vmem:[#allocation7 + $0x188] sm:$0xff]  }
 0x1f1   : > { %1504 = vmatprep.subr.bf16.mxu1 %v1898_v0 }
 0x1f4   : > { %1505 = vmatpush3.bf16.msra.mxu1 %v1696_v44  ;;  %v1727_v44 = vld [vmem:[#allocation7 + $0x190] sm:$0xff]  }
 0x1f5   : > { %1506 = vmatprep.subr.bf16.mxu1 %v1898_v0 }
 0x1f8   : > { %1507 = vmatpush3.bf16.msra.mxu1 %v1697_v45  ;;  %v1728_v45 = vld [vmem:[#allocation7 + $0x198] sm:$0xff]  }
 0x1f9   : > { %1508 = vmatprep.subr.bf16.mxu1 %v1898_v0 }
 0x1fc   : > { %1509 = vmatpush3.bf16.msra.mxu1 %v1698_v46  ;;  %v1729_v46 = vld [vmem:[#allocation7 + $0x1a0] sm:$0xff]  }
 0x1fd   : > { %1510 = vmatprep.subr.bf16.mxu1 %v1898_v0 }
 0x200   : > { %1511 = vmatpush3.bf16.msra.mxu1 %v1699_v55 }
 0x201   : > { %1512 = vmatprep.subr.bf16.mxu1 %v1898_v0 }
 0x204   : > { %1513 = vmatpush3.bf16.msra.mxu1 %v1700_v56  ;;  %v1731_v56 = vld [vmem:[#allocation7 + $0x1b0] sm:$0xff]  }
 0x205   : > { %1538 = vmatprep.subr.bf16.mxu1 %v1898_v0 }
 0x2ba   : > { %v471_v48 = vpop.f32.mrb[0].mxu1 }
 0x2bb   : > { %v472_v49 = vadd.f32 %v1293_v47, %v471_v48  ;;  %v1476_v50 = vpop.f32.mrb[1].mxu1  ;;  %v1730_v47 = vld [vmem:[#allocation7 + $0x1a8] sm:$0xff]   ;;  %v1333_v48 = vld [vmem:[%s2266_s3 + $0x5] ss:$0 sm:$0xff] }
 0x2bc   : > { %v474_v51 = vpop.f32.mrb[2].mxu1 }
 0x2bd   : > { %v477_v52 = vmax.f32 %v472_v49, 0.0  ;;  %v1477_v53 = vpop.f32.mrb[3].mxu1 }
 0x2bf   : > { %v478_v54 = vpack.c.bf16 %v477_v52, %v477_v52 }
 0x2c1   : > { %1495 = vmatmul.mubr.bf16.vlgmr.msra.gmra.mrb[4].mxu0 %v478_v54 }
 0x2c2   : > { %1534 = vmatprep.mubr.msk.bf16.mxu0 %vm1899_vm0, %v1898_v0  ;;  %1519 = vmatpush3.bf16.msra.mxu0 %v1701_v57  ;;  %v1732_v57 = vld [vmem:[#allocation7 + $0x1b8] sm:$0xff]  }
 0x2c3   : > { %1520 = vmatprep.subr.bf16.mxu0 %v1898_v0 }
 0x2c6   : > { %1521 = vmatpush3.bf16.msra.mxu0 %v1702_v58  ;;  %v1343_v58 = vld [vmem:[%s2266_s3 + $0x6] ss:$0 sm:$0xff] }
 0x2c7   : > { %1522 = vmatprep.subr.bf16.mxu0 %v1898_v0 }
 0x2ca   : > { %1523 = vmatpush3.bf16.msra.mxu0 %v1703_v59 }
 0x2cb   : > { %1524 = vmatprep.subr.bf16.mxu0 %v1898_v0 }
 0x2ce   : > { %1525 = vmatpush3.bf16.msra.mxu0 %v1704_v60 }
 0x2cf   : > { %1526 = vmatprep.subr.bf16.mxu0 %v1898_v0 }
 0x2d2   : > { %1527 = vmatpush3.bf16.msra.mxu0 %v1705_v61 }
 0x2d3   : > { %1528 = vmatprep.subr.bf16.mxu0 %v1898_v0 }
 0x2d6   : > { %1529 = vmatpush3.bf16.msra.mxu0 %v1706_v62 }
 0x2d7   : > { %1530 = vmatprep.subr.bf16.mxu0 %v1898_v0 }
 0x2da   : > { %1531 = vmatpush3.bf16.msra.mxu0 %v1707_v8 }
 0x2db   : > { %1532 = vmatprep.subr.bf16.mxu0 %v1898_v0 }
 0x2de   : > { %1533 = vmatpush3.bf16.msra.mxu0 %v1708_v9 }
 0x2df   : > { %1558 = vmatprep.subr.bf16.mxu0 %v1898_v0 }
 0x394   : > { %v586_v1 = vpop.f32.mrb[4].mxu0 }
 0x395   : > { %v587_v2 = vadd.f32 %v1303_v63, %v586_v1  ;;  %v1496_v3 = vpop.f32.mrb[5].mxu0 }
 0x396   : > { %v589_v4 = vpop.f32.mrb[6].mxu0 }
 0x397   : > { %v592_v5 = vmax.f32 %v587_v2, 0.0  ;;  %v1497_v6 = vpop.f32.mrb[7].mxu0 }
 0x399   : > { %v593_v7 = vpack.c.bf16 %v592_v5, %v592_v5 }
 0x39b   : > { %1515 = vmatmul.mubr.bf16.vlgmr.msra.gmra.mrb[4].mxu1 %v593_v7 }
 0x39c   : > { %1554 = vmatprep.mubr.msk.bf16.mxu1 %vm1899_vm0, %v1898_v0  ;;  %1539 = vmatpush3.bf16.msra.mxu1 %v1709_v10 }
 0x39d   : > { %1540 = vmatprep.subr.bf16.mxu1 %v1898_v0 }
 0x3a0   : > { %1541 = vmatpush3.bf16.msra.mxu1 %v1710_v11 }
 0x3a1   : > { %1542 = vmatprep.subr.bf16.mxu1 %v1898_v0 }
 0x3a4   : > { %1543 = vmatpush3.bf16.msra.mxu1 %v1711_v12 }
 0x3a5   : > { %1544 = vmatprep.subr.bf16.mxu1 %v1898_v0 }
 0x3a8   : > { %1545 = vmatpush3.bf16.msra.mxu1 %v1712_v13 }
 0x3a9   : > { %1546 = vmatprep.subr.bf16.mxu1 %v1898_v0 }
 0x3ac   : > { %1547 = vmatpush3.bf16.msra.mxu1 %v1713_v14 }
 0x3ad   : > { %1548 = vmatprep.subr.bf16.mxu1 %v1898_v0 }
 0x3b0   : > { %1549 = vmatpush3.bf16.msra.mxu1 %v1714_v15 }
 0x3b1   : > { %1550 = vmatprep.subr.bf16.mxu1 %v1898_v0 }
 0x3b4   : > { %1551 = vmatpush3.bf16.msra.mxu1 %v1715_v24 }
 0x3b5   : > { %1552 = vmatprep.subr.bf16.mxu1 %v1898_v0 }
 0x3b8   : > { %1553 = vmatpush3.bf16.msra.mxu1 %v1716_v25 }
 0x3b9   : > { %1578 = vmatprep.subr.bf16.mxu1 %v1898_v0 }
 0x46e   : > { %v701_v17 = vpop.f32.mrb[4].mxu1 }
 0x46f   : > { %v702_v18 = vadd.f32 %v1313_v16, %v701_v17  ;;  %v1516_v19 = vpop.f32.mrb[5].mxu1 }
 0x470   : > { %v704_v20 = vpop.f32.mrb[6].mxu1 }
 0x471   : > { %v707_v21 = vmax.f32 %v702_v18, 0.0  ;;  %v1517_v22 = vpop.f32.mrb[7].mxu1 }
 0x473   : > { %v708_v23 = vpack.c.bf16 %v707_v21, %v707_v21 }
 0x475   : > { %1535 = vmatmul.mubr.bf16.vlgmr.msra.gmra.mrb[8].mxu0 %v708_v23 }
 0x476   : > { %1574 = vmatprep.mubr.msk.bf16.mxu0 %vm1899_vm0, %v1898_v0  ;;  %1559 = vmatpush3.bf16.msra.mxu0 %v1717_v26 }
 0x477   : > { %1560 = vmatprep.subr.bf16.mxu0 %v1898_v0 }
 0x47a   : > { %1561 = vmatpush3.bf16.msra.mxu0 %v1718_v27 }
 0x47b   : > { %1562 = vmatprep.subr.bf16.mxu0 %v1898_v0 }
 0x47e   : > { %1563 = vmatpush3.bf16.msra.mxu0 %v1719_v28 }
 0x47f   : > { %1564 = vmatprep.subr.bf16.mxu0 %v1898_v0 }
 0x482   : > { %1565 = vmatpush3.bf16.msra.mxu0 %v1720_v29 }
 0x483   : > { %1566 = vmatprep.subr.bf16.mxu0 %v1898_v0 }
 0x486   : > { %1567 = vmatpush3.bf16.msra.mxu0 %v1721_v30 }
 0x487   : > { %1568 = vmatprep.subr.bf16.mxu0 %v1898_v0 }
 0x48a   : > { %1569 = vmatpush3.bf16.msra.mxu0 %v1722_v31 }
 0x48b   : > { %1570 = vmatprep.subr.bf16.mxu0 %v1898_v0 }
 0x48e   : > { %1571 = vmatpush3.bf16.msra.mxu0 %v1723_v40 }
 0x48f   : > { %1572 = vmatprep.subr.bf16.mxu0 %v1898_v0 }
 0x492   : > { %1573 = vmatpush3.bf16.msra.mxu0 %v1724_v41 }
 0x548   : > { %v816_v33 = vpop.f32.mrb[8].mxu0 }
 0x549   : > { %v817_v34 = vadd.f32 %v1323_v32, %v816_v33  ;;  %v1536_v35 = vpop.f32.mrb[9].mxu0 }
 0x54a   : > { %v819_v36 = vpop.f32.mrb[10].mxu0 }
 0x54b   : > { %v822_v37 = vmax.f32 %v817_v34, 0.0  ;;  %v1537_v38 = vpop.f32.mrb[11].mxu0 }
 0x54d   : > { %v823_v39 = vpack.c.bf16 %v822_v37, %v822_v37 }
 0x54f   : > { %1555 = vmatmul.mubr.bf16.vlgmr.msra.gmra.mrb[8].mxu1 %v823_v39 }
 0x550   : > { %1594 = vmatprep.mubr.msk.bf16.mxu1 %vm1899_vm0, %v1898_v0  ;;  %1579 = vmatpush3.bf16.msra.mxu1 %v1725_v42 }
 0x551   : > { %1580 = vmatprep.subr.bf16.mxu1 %v1898_v0 }
 0x554   : > { %1581 = vmatpush3.bf16.msra.mxu1 %v1726_v43 }
 0x555   : > { %1582 = vmatprep.subr.bf16.mxu1 %v1898_v0 }
 0x558   : > { %1583 = vmatpush3.bf16.msra.mxu1 %v1727_v44 }
 0x559   : > { %1584 = vmatprep.subr.bf16.mxu1 %v1898_v0 }
 0x55c   : > { %1585 = vmatpush3.bf16.msra.mxu1 %v1728_v45 }
 0x55d   : > { %1586 = vmatprep.subr.bf16.mxu1 %v1898_v0 }
 0x560   : > { %1587 = vmatpush3.bf16.msra.mxu1 %v1729_v46 }
 0x561   : > { %1588 = vmatprep.subr.bf16.mxu1 %v1898_v0 }
 0x564   : > { %1589 = vmatpush3.bf16.msra.mxu1 %v1730_v47 }
 0x565   : > { %1590 = vmatprep.subr.bf16.mxu1 %v1898_v0 }
 0x568   : > { %1591 = vmatpush3.bf16.msra.mxu1 %v1731_v56 }
 0x569   : > { %1592 = vmatprep.subr.bf16.mxu1 %v1898_v0  ;;  %v1353_v0 = vld [vmem:[%s2266_s3 + $0x7] ss:$0 sm:$0xff] }
 0x56c   : > { %1593 = vmatpush3.bf16.msra.mxu1 %v1732_v57 }
 0x622   : > { %v931_v49 = vpop.f32.mrb[8].mxu1 }
 0x623   : > { %v932_v50 = vadd.f32 %v1333_v48, %v931_v49  ;;  %v1556_v51 = vpop.f32.mrb[9].mxu1 }
 0x624   : > { %v934_v52 = vpop.f32.mrb[10].mxu1 }
 0x625   : > { %v937_v53 = vmax.f32 %v932_v50, 0.0  ;;  %v1557_v54 = vpop.f32.mrb[11].mxu1 }
 0x627   : > { %v938_v55 = vpack.c.bf16 %v937_v53, %v937_v53 }
 0x629   : > { %1575 = vmatmul.mubr.bf16.vlgmr.msra.gmra.mrb[12].mxu0 %v938_v55 }
 0x6fc   : > { %v1046_v59 = vpop.f32.mrb[12].mxu0 }
 0x6fd   : > { %v1047_v60 = vadd.f32 %v1343_v58, %v1046_v59  ;;  %v1576_v61 = vpop.f32.mrb[13].mxu0 }
 0x6fe   : > { %v1049_v62 = vpop.f32.mrb[14].mxu0 }
 0x6ff   : > { %v1052_v63 = vmax.f32 %v1047_v60, 0.0  ;;  %v1577_v1 = vpop.f32.mrb[15].mxu0 }
 0x701   : > { %v1053_v2 = vpack.c.bf16 %v1052_v63, %v1052_v63 }
 0x703   : > { %1595 = vmatmul.mubr.bf16.vlgmr.msra.gmra.mrb[12].mxu1 %v1053_v2 }
 0x7d6   : > { %v1161_v3 = vpop.f32.mrb[12].mxu1 }
 0x7d7   : > { %v1162_v4 = vadd.f32 %v1353_v0, %v1161_v3  ;;  %v1596_v5 = vpop.f32.mrb[13].mxu1 }
 0x7d8   : > { %v1164_v6 = vpop.f32.mrb[14].mxu1 }
 0x7d9   : > { %1167 = vst [vmem:[%s241_s27] sm:$0xff] %v1162_v4  ;;  %v1597_v7 = vpop.f32.mrb[15].mxu1 }
 0x7da   : > { %1834 = shalt.err (!%p1831_p2)
}
 0x7db   : > { %s1835_s29 = scalar_lea.hbm %s2219_s26, 128  ;;  %s1839_s12 = scalar_lea.hbm %s2267_s4, 256 }
 0x7dc   : > { %p1836_p13 = scmp.ne.s32.totalorder %s2219_s26, %s1835_s29  ;;  %p1840_p4 = scmp.lt.u32.totalorder %s2219_s26, %s2267_s4 }
 0x7dd   : > { %p1841_p5 = scmp.lt.u32.totalorder %s1839_s12, %s1835_s29  ;;  %p1843_p11 = scmp.lt.u32.totalorder %s1835_s29, %s2219_s26 }
 0x7de   : > { %p1837_p6 = pnand %p1836_p13, %p2281_p0 }
 0x7df   : > { %p1842_p8 = por %p1841_p5, %p1840_p4 }
 0x7e0   : > { %p1838_p10 = pneg %p1837_p6 }
 0x7e1   : > { %p1844_p1 = por %p1843_p11, %p1842_p8 }
 0x7e3   : > { %p1845_p3 = pnand %p1844_p1, %p1838_p10 }
 0x7e5   : > { %1848 = shalt.err (!%p1845_p3)
}
 0x7e6   : > { %1608 = dma.vmem_to_hbm [thread:$0]  (%p2281_p0), %s2221_s30, 128, %s2219_s26, %s1169_s19  }
 0x7e7 PF: > { %s1194_s21 = sand.u32 1, %s1879_s15   ;;  %p2282_p7 = scmp.ne.s32.totalorder %s2272_s22, 0 }
 0x7e8   : > { %p2283_p9 = scmp.ge.s32.totalorder %s1891_s18, 2  ;;  %s1195_s23 = scalar_lea.sflag [#allocation4], %s1194_s21 }
 0x7ea   : > { %p1622_p12 = pnand %p2283_p9, %p2282_p7 }
 0x7ec   : > { %1874 = dma.done.wait (!%p1622_p12), %s1195_s23, 128  }
 0x7ed   : > { %1876 = vsyncadd (!%p1622_p12), %s1195_s23, 4294967168  ;;  %p18_p2 = scmp.ge.s32.totalorder %s2036_s9, 4   ;;  %s2284_s15 = smov %s1883_s16 }
 0x7ee   : > { %s2285_s16 = smov %s1887_s17  ;;  %s2286_s17 = smov %s2052_s14 }
 0x7ef   : > { %s2287_s18 = smov %s2036_s9  ;;  %20 = sbr.rel (!%p18_p2) target bundleno = 6 (0x6), region = 102 }
 0x7f6   :  { %1200 = vsyncpa [#allocation3], 1 }
 0x7f7   :  { %1202 = vsyncpa [#allocation3 + $0x1], 1 }
 0x7f8   :  { %1203 = vsyncpa [#allocation6], 1 }
 0x7f9   :  { %1204 = vsyncpa [#allocation4], 1 }
 0x7fa   :  { %1206 = vsyncpa [#allocation4 + $0x1], 1 }

// kernel: tpu_custom_call.1
= control target key start
LH: loop header
LB: loop body
LE: loop exit
PB: predicated region body
PF: predicated region fallthrough
CT: control target
= control target key end

     0   :  { %9 = vsyncpa [#allocation3], 0  ;;  %s2263_s0 = inlined_call_operand.hbm [shape: f32[16,128], index: 0, kind: input, shape index: {}]   ;;  %s2264_s1 = inlined_call_operand.hbm [shape: bf16[128,128], index: 1, kind: input, shape index: {}]   ;;  %s2265_s2 = inlined_call_operand.hbm [shape: bf16[7,128,128], index: 2, kind: input, shape index: {}]   ;;  %s2266_s3 = inlined_call_operand.vmem [shape: f32[8,1,128], index: 3, kind: input, shape index: {}]   ;;  %s2267_s4 = inlined_call_operand.hbm [shape: f32[16,128], index: 4, kind: output, shape index: {}]  }
   0x1   :  { %11 = vsyncpa [#allocation3 + $0x1], 0 }
   0x2   :  { %12 = vsyncpa [#allocation6], 0 }
   0x3   :  { %13 = vsyncpa [#allocation4], 0 }
   0x4   :  { %15 = vsyncpa [#allocation4 + $0x1], 0  ;;  %s1926_s15 = smov 0   ;;  %s1928_s16 = smov 0  }
   0x5   :  { %s1930_s17 = smov 0   ;;  %s1932_s18 = smov 0  }
   0x6 LB: > { %s1947_s19 = sadd.s32 4294967295, %s1891_s18   ;;  %s1271_s20 = sadd.s32 4294967294, %s1891_s18   ;;  %s1891_s18 = sphi %s1932_s18, %s2287_s18   ;;  %s1887_s17 = sphi %s1930_s17, %s2286_s17   ;;  %s1883_s16 = sphi %s1928_s16, %s2285_s16   ;;  %s1879_s15 = sphi %s1926_s15, %s2284_s15  }
   0x7   : > { %p41_p0 = scmp.ne.s32.totalorder %s1883_s16, %s1879_s15  ;;  %p2268_p1 = scmp.eq.s32.totalorder %s1947_s19, 0 }
   0x8   : > { %p134_p3 = scmp.eq.s32.totalorder %s1271_s20, 1  ;;  %p1272_p5 = scmp.ge.s32.totalorder %s1891_s18, 1 }
   0x9   : > { %p1956_p4 = por %p2268_p1, %p41_p0  ;;  %p141_p7 = scmp.lt.s32.totalorder %s1891_s18, 3 }
   0xa   : > { %p1961_p6 = por %p134_p3, %p41_p0  ;;  %s1893_s24 = smov [#allocation5]  }
   0xb   : > { %s2271_s21 = scalar_select %p1956_p4, 1, 0 }
   0xc   : > { %s2272_s22 = scalar_select %p1961_p6, 1, 0 }
   0xd   : > { %p1966_p8 = pnand %p1272_p5, %p141_p7  ;;  %s153_s25 = sshll.u32 %s1893_s24, 4  ;;  %s1970_s25 = int_to_ptr.vmem [resolvable:$true] %s153_s25 }
   0xe   : > { %s1894_s27 = smov [#allocation7]   ;;  %s1735_s5 = scalar_lea.hbm %s2264_s1, 1024 }
   0xf   : > { %p1610_p9 = pneg %p1966_p8  ;;  %s166_s28 = sshll.u32 %s1894_s27, 4  ;;  %s1981_s28 = int_to_ptr.vmem [resolvable:$true] %s166_s28 }
  0x10   : > { %p1736_p12 = scmp.ne.s32.totalorder %s2264_s1, %s1735_s5  ;;  %p1742_p5 = scmp.lt.u32.totalorder %s1735_s5, %s2264_s1 }
  0x11   : > { %p1977_p11 = pnand %p1610_p9, %p2268_p1 }
  0x13   : > { %p1737_p13 = pneg %p1977_p11 }
  0x15   : > { %p1738_p0 = pnand %p1737_p13, %p1736_p12 }
  0x17   : > { %p1739_p3 = pneg %p1738_p0 }
  0x19   : > { %p1744_p7 = pnand %p1742_p5, %p1739_p3 }
  0x1b   : > { %1747 = shalt.err (!%p1744_p7)
}
  0x1c   : > { %s1748_s10 = scalar_lea.vmem %s1970_s25, 1024  ;;  %p1756_p2 = scmp.lt.s32.totalorder %s1970_s25, %s1970_s25 }
  0x1d   : > { %p1749_p9 = scmp.ne.s32.totalorder %s1970_s25, %s1748_s10  ;;  %p1757_p12 = scmp.lt.s32.totalorder %s1748_s10, %s1748_s10 }
  0x1f   : > { %p1751_p10 = pnand %p1749_p9, %p1737_p13  ;;  %p1758_p0 = por %p1757_p12, %p1756_p2 }
  0x21   : > { %p1752_p1 = pneg %p1751_p10 }
  0x23   : > { %p1759_p6 = pnand %p1758_p0, %p1752_p1 }
  0x25   : > { %1762 = shalt.err (!%p1759_p6)
}
  0x26   : > { %s1895_s11 = smov 64   ;;  %s1896_s12 = smov 4  }
  0x27   : > { %1613 = dma.hbm_to_vmem [thread:$0]  (!%p1977_p11), %s2264_s1, 1024, %s1970_s25, [#allocation6], %s1895_s11, %s1895_s11, %s1896_s12  }
  0x28   : > { %s1763_s27 = scalar_lea.hbm %s2265_s2, 7168 }
  0x29   : > { %p1764_p2 = scmp.ne.s32.totalorder %s2265_s2, %s1763_s27  ;;  %p1770_p10 = scmp.lt.u32.totalorder %s1763_s27, %s2265_s2 }
  0x2b   : > { %p1766_p1 = pnand %p1764_p2, %p1737_p13 }
  0x2d   : > { %p1767_p6 = pneg %p1766_p1 }
  0x2f   : > { %p1772_p3 = pnand %p1770_p10, %p1767_p6 }
  0x31   : > { %1775 = shalt.err (!%p1772_p3)
}
  0x32   : > { %s1776_s25 = scalar_lea.vmem %s1981_s28, 7168  ;;  %p1784_p12 = scmp.lt.s32.totalorder %s1981_s28, %s1981_s28 }
  0x33   : > { %p1777_p5 = scmp.ne.s32.totalorder %s1981_s28, %s1776_s25  ;;  %p1785_p0 = scmp.lt.s32.totalorder %s1776_s25, %s1776_s25 }
  0x35   : > { %p1779_p7 = pnand %p1777_p5, %p1737_p13  ;;  %p1786_p2 = por %p1785_p0, %p1784_p12 }
  0x37   : > { %p1780_p9 = pneg %p1779_p7 }
  0x39   : > { %p1787_p1 = pnand %p1786_p2, %p1780_p9 }
  0x3b   : > { %1790 = shalt.err (!%p1787_p1)
}
  0x3c   : > { %1616 = dma.hbm_to_vmem [thread:$0]  (!%p1977_p11), %s2265_s2, 7168, %s1981_s28, [#allocation6], %s1895_s11, %s1895_s11, %s1896_s12  }
  0x3d   : > { %s2036_s9 = sadd.s32 1, %s1891_s18   ;;  %s28_s26 = sadd.s32 1, %s1887_s17 }
  0x3e   : > { %s25_s10 = ssub.s32 %s1891_s18, %s2036_s9  ;;  %p35_p13 = scmp.ne.s32.totalorder %s1887_s17, %s1883_s16 }
  0x3f   : > { %p26_p6 = scmp.eq.s32.totalorder %s25_s10, 0  ;;  %p36_p10 = scmp.eq.s32.totalorder %s1891_s18, 0 }
  0x40   : > { %p2275_p3 = scmp.eq.s32.totalorder %s1947_s19, 1  ;;  %p1627_p7 = scmp.lt.s32.totalorder %s1891_s18, 2 }
  0x41   : > { %s2052_s14 = scalar_select %p26_p6, %s1887_s17, %s28_s26  }
  0x42   : > { %p2046_p5 = por %p2275_p3, %p35_p13  ;;  %p37_p9 = por %p36_p10, %p35_p13 }
  0x43   : > { %s183_s20 = sand.u32 1, %s1887_s17   ;;  %s1277_s28 = sshll.u32 %s1891_s18, 7 }
  0x44   : > { %s2276_s13 = scalar_select %p2046_p5, 1, 0 }
  0x45   : > { %s1276_s24 = sshll.u32 %s183_s20, 3  ;;  %s2059_s27 = scalar_lea.hbm %s2263_s0, %s1277_s28 }
  0x46   : > { %s187_s29 = scalar_lea.vmem [#allocation2], %s1276_s24  ;;  %p2063_p11 = pnand %p1627_p7, %p37_p9 }
  0x47   : > { %s194_s30 = sshll.u32 %s187_s29, 4  ;;  %s184_s6 = scalar_lea.sflag [#allocation3], %s183_s20  ;;  %s2061_s30 = int_to_ptr.vmem [resolvable:$true] %s194_s30 }
  0x48   : > { %s1791_s25 = scalar_lea.hbm %s2059_s27, 128  ;;  %p1793_p0 = pneg %p2063_p11 }
  0x49   : > { %p1792_p12 = scmp.ne.s32.totalorder %s2059_s27, %s1791_s25  ;;  %s1796_s26 = scalar_lea.hbm %s2263_s0, 256 }
  0x4a   : > { %p1797_p13 = scmp.lt.u32.totalorder %s2059_s27, %s2263_s0  ;;  %p1798_p6 = scmp.lt.u32.totalorder %s1796_s26, %s1791_s25 }
  0x4b   : > { %p1794_p2 = pnand %p1793_p0, %p1792_p12  ;;  %p1800_p3 = scmp.lt.u32.totalorder %s1791_s25, %s2059_s27 }
  0x4c   : > { %p1799_p10 = por %p1798_p6, %p1797_p13 }
  0x4d   : > { %p1795_p1 = pneg %p1794_p2 }
  0x4e   : > { %p1801_p7 = por %p1800_p3, %p1799_p10 }
  0x50   : > { %p1802_p9 = pnand %p1801_p7, %p1795_p1 }
  0x52   : > { %1805 = shalt.err (!%p1802_p9)
}
  0x53   : > { %s1806_s20 = scalar_lea.vmem %s2061_s30, 128  ;;  %s1897_s28 = smov [#allocation2]  }
  0x54   : > { %p1807_p12 = scmp.ne.s32.totalorder %s2061_s30, %s1806_s20  ;;  %s1811_s11 = sshll.u32 %s1897_s28, 4  ;;  %s1812_s11 = int_to_ptr.vmem [resolvable:$false] %s1811_s11 }
  0x55   : > { %s1813_s12 = scalar_lea.vmem %s1812_s11, 256  ;;  %p1814_p4 = scmp.lt.s32.totalorder %s2061_s30, %s1812_s11 }
  0x56   : > { %p1809_p2 = pnand %p1807_p12, %p1793_p0  ;;  %p1815_p13 = scmp.lt.s32.totalorder %s1813_s12, %s1806_s20 }
  0x58   : > { %p1810_p5 = pneg %p1809_p2  ;;  %p1816_p6 = por %p1815_p13, %p1814_p4 }
  0x5a   : > { %p1817_p10 = pnand %p1816_p6, %p1810_p5 }
  0x5c   : > { %1820 = shalt.err (!%p1817_p10)
}
  0x5d   : > { %1620 = dma.hbm_to_vmem [thread:$0]  (!%p2063_p11), %s2059_s27, 128, %s2061_s30, %s184_s6  }
  0x5e   : > { %203 = sbr.rel (%p1966_p8) target bundleno = 2023 (0x7e7), region = 36  ;;  %s2095_s29 = sand.u32 (!%p1966_p8), 1, %s1883_s16  }
  0x5f   : > { %s1279_s25 = sshll.u32 (!%p1966_p8), %s2095_s29, 3  ;;  %s206_s7 = scalar_lea.sflag (!%p1966_p8), [#allocation3], %s2095_s29 }
  0x60   : > { %s209_s8 = scalar_lea.vmem (!%p1966_p8), [#allocation2], %s1279_s25  ;;  %p2278_p4 = scmp.ne.s32.totalorder (!%p1966_p8), %s2271_s21, 0 }
  0x65   : > { %1866 = dma.done.wait (%p2278_p4), %s206_s7, 128  }
  0x66   : > { %1868 = vsyncadd (%p2278_p4), %s206_s7, 4294967168  ;;  %p2279_p5 = scmp.eq.s32.totalorder %s1947_s19, 0 }
  0x68   : > { %1870 = dma.done.wait (%p2279_p5), [#allocation6], 8192   ;;  %p2280_p8 = pmov %p2279_p5 }
  0x69   : > { %v1898_v0 = vmov 0.0   ;;  %v243_v1 = vld [vmem:[%s209_s8] sm:$0xff]  ;;  %v1669_v3 = vld [vmem:[#allocation5] sm:$0xff]   ;;  %v1670_v4 = vld [vmem:[#allocation5 + $0x8] sm:$0xff]   ;;  %vm1899_vm0 = vmmov 0   ;;  %s1363_s23 = sshll.u32 %s1947_s19, 7 }
  0x6a   : > { %1872 = vsyncadd (%p2280_p8), [#allocation6], 4294959104  ;;  %1438 = vmatprep.subr.bf16.mxu0 %v1898_v0  ;;  %1458 = vmatprep.subr.bf16.mxu1 %v1898_v0  ;;  %v244_v2 = vmul.f32 %v243_v1, %v243_v1  ;;  %v1671_v5 = vld [vmem:[#allocation5 + $0x10] sm:$0xff]   ;;  %v1672_v6 = vld [vmem:[#allocation5 + $0x18] sm:$0xff]   ;;  %s241_s27 = scalar_lea.vmem [#allocation8], %s1279_s25  ;;  %s2219_s26 = scalar_lea.hbm %s2267_s4, %s1363_s23 }
  0x6b   : > { %1439 = vmatpush3.bf16.msra.mxu0 %v1669_v3  ;;  %v1673_v7 = vld [vmem:[#allocation5 + $0x20] sm:$0xff]   ;;  %v1674_v8 = vld [vmem:[#allocation5 + $0x28] sm:$0xff]   ;;  %1454 = vmatprep.mubr.msk.bf16.mxu0 %vm1899_vm0, %v1898_v0  ;;  %v1675_v9 = vld [vmem:[#allocation5 + $0x30] sm:$0xff]   ;;  %s1182_s30 = sshll.u32 %s241_s27, 4  ;;  %s1169_s19 = scalar_lea.sflag [#allocation4], %s2095_s29  ;;  %s2221_s30 = int_to_ptr.vmem [resolvable:$true] %s1182_s30 }
  0x6c   : > { %245 = vadd.xlane.f32.xlu0 %v244_v2  ;;  %1440 = vmatprep.subr.bf16.mxu0 %v1898_v0  ;;  %v1676_v10 = vld [vmem:[#allocation5 + $0x38] sm:$0xff]   ;;  %v1677_v11 = vld [vmem:[#allocation7] sm:$0xff]   ;;  %v1678_v12 = vld [vmem:[#allocation7 + $0x8] sm:$0xff]   ;;  %s1821_s10 = scalar_lea.vmem %s2221_s30, 128  ;;  %p2281_p0 = scmp.ne.s32.totalorder %s2276_s13, 0 }
  0x6d   : > { %1474 = vmatprep.mubr.msk.bf16.mxu1 %vm1899_vm0, %v1898_v0  ;;  %1459 = vmatpush3.bf16.msra.mxu1 %v1677_v11  ;;  %v1679_v13 = vld [vmem:[#allocation7 + $0x10] sm:$0xff]   ;;  %v1680_v14 = vld [vmem:[#allocation7 + $0x18] sm:$0xff]   ;;  %v1681_v15 = vld [vmem:[#allocation7 + $0x20] sm:$0xff]   ;;  %p1822_p11 = scmp.ne.s32.totalorder %s2221_s30, %s1821_s10  ;;  %s1900_s25 = smov [#allocation8]  }
  0x6e   : > { %1460 = vmatprep.subr.bf16.mxu1 %v1898_v0  ;;  %v1682_v16 = vld [vmem:[#allocation7 + $0x28] sm:$0xff]   ;;  %v1683_v23 = vld [vmem:[#allocation7 + $0x30] sm:$0xff]   ;;  %v1684_v24 = vld [vmem:[#allocation7 + $0x38] sm:$0xff]   ;;  %s1825_s24 = sshll.u32 %s1900_s25, 4  ;;  %s1826_s24 = int_to_ptr.vmem [resolvable:$false] %s1825_s24 }
  0x6f   : > { %1441 = vmatpush3.bf16.msra.mxu0 %v1670_v4  ;;  %v1685_v25 = vld [vmem:[#allocation7 + $0x40] sm:$0xff]   ;;  %v1686_v26 = vld [vmem:[#allocation7 + $0x48] sm:$0xff]   ;;  %v1687_v27 = vld [vmem:[#allocation7 + $0x50] sm:$0xff]   ;;  %p1823_p1 = pnand %p1822_p11, %p2281_p0  ;;  %s1827_s20 = scalar_lea.vmem %s1826_s24, 256 }
  0x70   : > { %1442 = vmatprep.subr.bf16.mxu0 %v1898_v0  ;;  %v1688_v28 = vld [vmem:[#allocation7 + $0x58] sm:$0xff]   ;;  %v1689_v29 = vld [vmem:[#allocation7 + $0x60] sm:$0xff]   ;;  %v1690_v30 = vld [vmem:[#allocation7 + $0x68] sm:$0xff]   ;;  %p1828_p7 = scmp.lt.s32.totalorder %s2221_s30, %s1826_s24  ;;  %p1829_p9 = scmp.lt.s32.totalorder %s1827_s20, %s1821_s10 }
  0x71   : > { %1461 = vmatpush3.bf16.msra.mxu1 %v1678_v12  ;;  %v1283_v31 = vld [vmem:[%s2266_s3] ss:$0 sm:$0xff]  ;;  %v1692_v40 = vld [vmem:[#allocation7 + $0x78] sm:$0xff]   ;;  %v1693_v41 = vld [vmem:[#allocation7 + $0x80] sm:$0xff]   ;;  %p1824_p3 = pneg %p1823_p1 }
  0x72   : > { %1462 = vmatprep.subr.bf16.mxu1 %v1898_v0  ;;  %v1691_v39 = vld [vmem:[#allocation7 + $0x70] sm:$0xff]   ;;  %v1694_v42 = vld [vmem:[#allocation7 + $0x88] sm:$0xff]   ;;  %v1696_v44 = vld [vmem:[#allocation7 + $0x98] sm:$0xff]   ;;  %p1830_p12 = por %p1829_p9, %p1828_p7 }
  0x73   : > { %1443 = vmatpush3.bf16.msra.mxu0 %v1671_v5  ;;  %v1695_v43 = vld [vmem:[#allocation7 + $0x90] sm:$0xff]   ;;  %v1697_v45 = vld [vmem:[#allocation7 + $0xa0] sm:$0xff]   ;;  %v1698_v46 = vld [vmem:[#allocation7 + $0xa8] sm:$0xff]  }
  0x74   : > { %1444 = vmatprep.subr.bf16.mxu0 %v1898_v0  ;;  %v1293_v47 = vld [vmem:[%s2266_s3 + $0x1] ss:$0 sm:$0xff]  ;;  %v1700_v56 = vld [vmem:[#allocation7 + $0xb8] sm:$0xff]   ;;  %v1701_v57 = vld [vmem:[#allocation7 + $0xc0] sm:$0xff]   ;;  %p1831_p2 = pnand %p1830_p12, %p1824_p3 }
  0x75   : > { %1463 = vmatpush3.bf16.msra.mxu1 %v1679_v13  ;;  %v1699_v55 = vld [vmem:[#allocation7 + $0xb0] sm:$0xff]   ;;  %v1702_v58 = vld [vmem:[#allocation7 + $0xc8] sm:$0xff]   ;;  %v1704_v60 = vld [vmem:[#allocation7 + $0xd8] sm:$0xff]  }
  0x76   : > { %1464 = vmatprep.subr.bf16.mxu1 %v1898_v0  ;;  %v1703_v59 = vld [vmem:[#allocation7 + $0xd0] sm:$0xff]   ;;  %v1705_v61 = vld [vmem:[#allocation7 + $0xe0] sm:$0xff]   ;;  %v1706_v62 = vld [vmem:[#allocation7 + $0xe8] sm:$0xff]  }
  0x77   : > { %1445 = vmatpush3.bf16.msra.mxu0 %v1672_v6  ;;  %v1303_v63 = vld [vmem:[%s2266_s3 + $0x2] ss:$0 sm:$0xff]  ;;  %v1710_v11 = vld [vmem:[#allocation7 + $0x108] sm:$0xff]   ;;  %v1712_v13 = vld [vmem:[#allocation7 + $0x118] sm:$0xff]  }
  0x78   : > { %1446 = vmatprep.subr.bf16.mxu0 %v1898_v0  ;;  %v1711_v12 = vld [vmem:[#allocation7 + $0x110] sm:$0xff]  }
  0x79   : > { %1465 = vmatpush3.bf16.msra.mxu1 %v1680_v14  ;;  %v1713_v14 = vld [vmem:[#allocation7 + $0x120] sm:$0xff]  }
  0x7a   : > { %1466 = vmatprep.subr.bf16.mxu1 %v1898_v0 }
  0x7b   : > { %1447 = vmatpush3.bf16.msra.mxu0 %v1673_v7 }
  0x7c   : > { %1448 = vmatprep.subr.bf16.mxu0 %v1898_v0 }
  0x7d   : > { %1467 = vmatpush3.bf16.msra.mxu1 %v1681_v15  ;;  %v1714_v15 = vld [vmem:[#allocation7 + $0x128] sm:$0xff]  }
  0x7e   : > { %1468 = vmatprep.subr.bf16.mxu1 %v1898_v0 }
  0x7f   : > { %1449 = vmatpush3.bf16.msra.mxu0 %v1674_v8  ;;  %v1707_v8 = vld [vmem:[#allocation7 + $0xf0] sm:$0xff]  }
  0x80   : > { %1450 = vmatprep.subr.bf16.mxu0 %v1898_v0 }
  0x81   : > { %1469 = vmatpush3.bf16.msra.mxu1 %v1682_v16  ;;  %v1313_v16 = vld [vmem:[%s2266_s3 + $0x3] ss:$0 sm:$0xff] }
  0x82   : > { %1470 = vmatprep.subr.bf16.mxu1 %v1898_v0 }
  0x83   : > { %1451 = vmatpush3.bf16.msra.mxu0 %v1675_v9  ;;  %v1708_v9 = vld [vmem:[#allocation7 + $0xf8] sm:$0xff]  }
  0x84   : > { %1452 = vmatprep.subr.bf16.mxu0 %v1898_v0 }
  0x85   : > { %1471 = vmatpush3.bf16.msra.mxu1 %v1683_v23 }
  0x86   : > { %1472 = vmatprep.subr.bf16.mxu1 %v1898_v0 }
  0x87   : > { %1453 = vmatpush3.bf16.msra.mxu0 %v1676_v10  ;;  %v1709_v10 = vld [vmem:[#allocation7 + $0x100] sm:$0xff]  }
  0x88   : > { %1478 = vmatprep.subr.bf16.mxu0 %v1898_v0 }
  0x89   : > { %1473 = vmatpush3.bf16.msra.mxu1 %v1684_v24  ;;  %v1715_v24 = vld [vmem:[#allocation7 + $0x130] sm:$0xff]  }
  0x8a   : > { %1498 = vmatprep.subr.bf16.mxu1 %v1898_v0 }
  0xf9   : > { %v246_v17 = vpop.xlane.xlu0 %245 }
  0xfa   : > { %v247_v18 = vmul.f32 0.0078125, %v246_v17 }
  0xfc   : > { %v248_v19 = vadd.f32 1e-08, %v247_v18 }
  0xfe   : > { %1733 = vrsqrt.f32 %v248_v19 }
 0x108   : > { %v1734_v20 = vpop.eup %1733 }
 0x109   : > { %v250_v21 = vmul.f32 %v1734_v20, %v243_v1 }
 0x10b   : > { %v251_v22 = vpack.c.bf16 %v250_v21, %v250_v21 }
 0x10d   : > { %1455 = vmatmul.mubr.bf16.vlgmr.msra.gmra.mrb[0].mxu0 %v251_v22 }
 0x10e   : > { %1494 = vmatprep.mubr.msk.bf16.mxu0 %vm1899_vm0, %v1898_v0  ;;  %1479 = vmatpush3.bf16.msra.mxu0 %v1685_v25  ;;  %v1716_v25 = vld [vmem:[#allocation7 + $0x138] sm:$0xff]  }
 0x10f   : > { %1480 = vmatprep.subr.bf16.mxu0 %v1898_v0 }
 0x112   : > { %1481 = vmatpush3.bf16.msra.mxu0 %v1686_v26  ;;  %v1717_v26 = vld [vmem:[#allocation7 + $0x140] sm:$0xff]  }
 0x113   : > { %1482 = vmatprep.subr.bf16.mxu0 %v1898_v0 }
 0x116   : > { %1483 = vmatpush3.bf16.msra.mxu0 %v1687_v27  ;;  %v1718_v27 = vld [vmem:[#allocation7 + $0x148] sm:$0xff]  }
 0x117   : > { %1484 = vmatprep.subr.bf16.mxu0 %v1898_v0 }
 0x11a   : > { %1485 = vmatpush3.bf16.msra.mxu0 %v1688_v28  ;;  %v1719_v28 = vld [vmem:[#allocation7 + $0x150] sm:$0xff]  }
 0x11b   : > { %1486 = vmatprep.subr.bf16.mxu0 %v1898_v0 }
 0x11e   : > { %1487 = vmatpush3.bf16.msra.mxu0 %v1689_v29  ;;  %v1720_v29 = vld [vmem:[#allocation7 + $0x158] sm:$0xff]  }
 0x11f   : > { %1488 = vmatprep.subr.bf16.mxu0 %v1898_v0 }
 0x122   : > { %1489 = vmatpush3.bf16.msra.mxu0 %v1690_v30  ;;  %v1721_v30 = vld [vmem:[#allocation7 + $0x160] sm:$0xff]  }
 0x123   : > { %1490 = vmatprep.subr.bf16.mxu0 %v1898_v0 }
 0x126   : > { %1491 = vmatpush3.bf16.msra.mxu0 %v1691_v39 }
 0x127   : > { %1492 = vmatprep.subr.bf16.mxu0 %v1898_v0 }
 0x12a   : > { %1493 = vmatpush3.bf16.msra.mxu0 %v1692_v40  ;;  %v1723_v40 = vld [vmem:[#allocation7 + $0x170] sm:$0xff]  }
 0x12b   : > { %1518 = vmatprep.subr.bf16.mxu0 %v1898_v0 }
 0x1e0   : > { %v357_v32 = vpop.f32.mrb[0].mxu0 }
 0x1e1   : > { %v358_v33 = vadd.f32 %v1283_v31, %v357_v32  ;;  %v1456_v34 = vpop.f32.mrb[1].mxu0  ;;  %v1722_v31 = vld [vmem:[#allocation7 + $0x168] sm:$0xff]   ;;  %v1323_v32 = vld [vmem:[%s2266_s3 + $0x4] ss:$0 sm:$0xff] }
 0x1e2   : > { %v360_v35 = vpop.f32.mrb[2].mxu0 }
 0x1e3   : > { %v363_v36 = vmax.f32 %v358_v33, 0.0  ;;  %v1457_v37 = vpop.f32.mrb[3].mxu0 }
 0x1e5   : > { %v364_v38 = vpack.c.bf16 %v363_v36, %v363_v36 }
 0x1e7   : > { %1475 = vmatmul.mubr.bf16.vlgmr.msra.gmra.mrb[0].mxu1 %v364_v38 }
 0x1e8   : > { %1514 = vmatprep.mubr.msk.bf16.mxu1 %vm1899_vm0, %v1898_v0  ;;  %1499 = vmatpush3.bf16.msra.mxu1 %v1693_v41  ;;  %v1724_v41 = vld [vmem:[#allocation7 + $0x178] sm:$0xff]  }
 0x1e9   : > { %1500 = vmatprep.subr.bf16.mxu1 %v1898_v0 }
 0x1ec   : > { %1501 = vmatpush3.bf16.msra.mxu1 %v1694_v42  ;;  %v1725_v42 = vld [vmem:[#allocation7 + $0x180] sm:$0xff]  }
 0x1ed   : > { %1502 = vmatprep.subr.bf16.mxu1 %v1898_v0 }
 0x1f0   : > { %1503 = vmatpush3.bf16.msra.mxu1 %v1695_v43  ;;  %v1726_v43 = vld [vmem:[#allocation7 + $0x188] sm:$0xff]  }
 0x1f1   : > { %1504 = vmatprep.subr.bf16.mxu1 %v1898_v0 }
 0x1f4   : > { %1505 = vmatpush3.bf16.msra.mxu1 %v1696_v44  ;;  %v1727_v44 = vld [vmem:[#allocation7 + $0x190] sm:$0xff]  }
 0x1f5   : > { %1506 = vmatprep.subr.bf16.mxu1 %v1898_v0 }
 0x1f8   : > { %1507 = vmatpush3.bf16.msra.mxu1 %v1697_v45  ;;  %v1728_v45 = vld [vmem:[#allocation7 + $0x198] sm:$0xff]  }
 0x1f9   : > { %1508 = vmatprep.subr.bf16.mxu1 %v1898_v0 }
 0x1fc   : > { %1509 = vmatpush3.bf16.msra.mxu1 %v1698_v46  ;;  %v1729_v46 = vld [vmem:[#allocation7 + $0x1a0] sm:$0xff]  }
 0x1fd   : > { %1510 = vmatprep.subr.bf16.mxu1 %v1898_v0 }
 0x200   : > { %1511 = vmatpush3.bf16.msra.mxu1 %v1699_v55 }
 0x201   : > { %1512 = vmatprep.subr.bf16.mxu1 %v1898_v0 }
 0x204   : > { %1513 = vmatpush3.bf16.msra.mxu1 %v1700_v56  ;;  %v1731_v56 = vld [vmem:[#allocation7 + $0x1b0] sm:$0xff]  }
 0x205   : > { %1538 = vmatprep.subr.bf16.mxu1 %v1898_v0 }
 0x2ba   : > { %v471_v48 = vpop.f32.mrb[0].mxu1 }
 0x2bb   : > { %v472_v49 = vadd.f32 %v1293_v47, %v471_v48  ;;  %v1476_v50 = vpop.f32.mrb[1].mxu1  ;;  %v1730_v47 = vld [vmem:[#allocation7 + $0x1a8] sm:$0xff]   ;;  %v1333_v48 = vld [vmem:[%s2266_s3 + $0x5] ss:$0 sm:$0xff] }
 0x2bc   : > { %v474_v51 = vpop.f32.mrb[2].mxu1 }
 0x2bd   : > { %v477_v52 = vmax.f32 %v472_v49, 0.0  ;;  %v1477_v53 = vpop.f32.mrb[3].mxu1 }
 0x2bf   : > { %v478_v54 = vpack.c.bf16 %v477_v52, %v477_v52 }
 0x2c1   : > { %1495 = vmatmul.mubr.bf16.vlgmr.msra.gmra.mrb[4].mxu0 %v478_v54 }
 0x2c2   : > { %1534 = vmatprep.mubr.msk.bf16.mxu0 %vm1899_vm0, %v1898_v0  ;;  %1519 = vmatpush3.bf16.msra.mxu0 %v1701_v57  ;;  %v1732_v57 = vld [vmem:[#allocation7 + $0x1b8] sm:$0xff]  }
 0x2c3   : > { %1520 = vmatprep.subr.bf16.mxu0 %v1898_v0 }
 0x2c6   : > { %1521 = vmatpush3.bf16.msra.mxu0 %v1702_v58  ;;  %v1343_v58 = vld [vmem:[%s2266_s3 + $0x6] ss:$0 sm:$0xff] }
 0x2c7   : > { %1522 = vmatprep.subr.bf16.mxu0 %v1898_v0 }
 0x2ca   : > { %1523 = vmatpush3.bf16.msra.mxu0 %v1703_v59 }
 0x2cb   : > { %1524 = vmatprep.subr.bf16.mxu0 %v1898_v0 }
 0x2ce   : > { %1525 = vmatpush3.bf16.msra.mxu0 %v1704_v60 }
 0x2cf   : > { %1526 = vmatprep.subr.bf16.mxu0 %v1898_v0 }
 0x2d2   : > { %1527 = vmatpush3.bf16.msra.mxu0 %v1705_v61 }
 0x2d3   : > { %1528 = vmatprep.subr.bf16.mxu0 %v1898_v0 }
 0x2d6   : > { %1529 = vmatpush3.bf16.msra.mxu0 %v1706_v62 }
 0x2d7   : > { %1530 = vmatprep.subr.bf16.mxu0 %v1898_v0 }
 0x2da   : > { %1531 = vmatpush3.bf16.msra.mxu0 %v1707_v8 }
 0x2db   : > { %1532 = vmatprep.subr.bf16.mxu0 %v1898_v0 }
 0x2de   : > { %1533 = vmatpush3.bf16.msra.mxu0 %v1708_v9 }
 0x2df   : > { %1558 = vmatprep.subr.bf16.mxu0 %v1898_v0 }
 0x394   : > { %v586_v1 = vpop.f32.mrb[4].mxu0 }
 0x395   : > { %v587_v2 = vadd.f32 %v1303_v63, %v586_v1  ;;  %v1496_v3 = vpop.f32.mrb[5].mxu0 }
 0x396   : > { %v589_v4 = vpop.f32.mrb[6].mxu0 }
 0x397   : > { %v592_v5 = vmax.f32 %v587_v2, 0.0  ;;  %v1497_v6 = vpop.f32.mrb[7].mxu0 }
 0x399   : > { %v593_v7 = vpack.c.bf16 %v592_v5, %v592_v5 }
 0x39b   : > { %1515 = vmatmul.mubr.bf16.vlgmr.msra.gmra.mrb[4].mxu1 %v593_v7 }
 0x39c   : > { %1554 = vmatprep.mubr.msk.bf16.mxu1 %vm1899_vm0, %v1898_v0  ;;  %1539 = vmatpush3.bf16.msra.mxu1 %v1709_v10 }
 0x39d   : > { %1540 = vmatprep.subr.bf16.mxu1 %v1898_v0 }
 0x3a0   : > { %1541 = vmatpush3.bf16.msra.mxu1 %v1710_v11 }
 0x3a1   : > { %1542 = vmatprep.subr.bf16.mxu1 %v1898_v0 }
 0x3a4   : > { %1543 = vmatpush3.bf16.msra.mxu1 %v1711_v12 }
 0x3a5   : > { %1544 = vmatprep.subr.bf16.mxu1 %v1898_v0 }
 0x3a8   : > { %1545 = vmatpush3.bf16.msra.mxu1 %v1712_v13 }
 0x3a9   : > { %1546 = vmatprep.subr.bf16.mxu1 %v1898_v0 }
 0x3ac   : > { %1547 = vmatpush3.bf16.msra.mxu1 %v1713_v14 }
 0x3ad   : > { %1548 = vmatprep.subr.bf16.mxu1 %v1898_v0 }
 0x3b0   : > { %1549 = vmatpush3.bf16.msra.mxu1 %v1714_v15 }
 0x3b1   : > { %1550 = vmatprep.subr.bf16.mxu1 %v1898_v0 }
 0x3b4   : > { %1551 = vmatpush3.bf16.msra.mxu1 %v1715_v24 }
 0x3b5   : > { %1552 = vmatprep.subr.bf16.mxu1 %v1898_v0 }
 0x3b8   : > { %1553 = vmatpush3.bf16.msra.mxu1 %v1716_v25 }
 0x3b9   : > { %1578 = vmatprep.subr.bf16.mxu1 %v1898_v0 }
 0x46e   : > { %v701_v17 = vpop.f32.mrb[4].mxu1 }
 0x46f   : > { %v702_v18 = vadd.f32 %v1313_v16, %v701_v17  ;;  %v1516_v19 = vpop.f32.mrb[5].mxu1 }
 0x470   : > { %v704_v20 = vpop.f32.mrb[6].mxu1 }
 0x471   : > { %v707_v21 = vmax.f32 %v702_v18, 0.0  ;;  %v1517_v22 = vpop.f32.mrb[7].mxu1 }
 0x473   : > { %v708_v23 = vpack.c.bf16 %v707_v21, %v707_v21 }
 0x475   : > { %1535 = vmatmul.mubr.bf16.vlgmr.msra.gmra.mrb[8].mxu0 %v708_v23 }
 0x476   : > { %1574 = vmatprep.mubr.msk.bf16.mxu0 %vm1899_vm0, %v1898_v0  ;;  %1559 = vmatpush3.bf16.msra.mxu0 %v1717_v26 }
 0x477   : > { %1560 = vmatprep.subr.bf16.mxu0 %v1898_v0 }
 0x47a   : > { %1561 = vmatpush3.bf16.msra.mxu0 %v1718_v27 }
 0x47b   : > { %1562 = vmatprep.subr.bf16.mxu0 %v1898_v0 }
 0x47e   : > { %1563 = vmatpush3.bf16.msra.mxu0 %v1719_v28 }
 0x47f   : > { %1564 = vmatprep.subr.bf16.mxu0 %v1898_v0 }
 0x482   : > { %1565 = vmatpush3.bf16.msra.mxu0 %v1720_v29 }
 0x483   : > { %1566 = vmatprep.subr.bf16.mxu0 %v1898_v0 }
 0x486   : > { %1567 = vmatpush3.bf16.msra.mxu0 %v1721_v30 }
 0x487   : > { %1568 = vmatprep.subr.bf16.mxu0 %v1898_v0 }
 0x48a   : > { %1569 = vmatpush3.bf16.msra.mxu0 %v1722_v31 }
 0x48b   : > { %1570 = vmatprep.subr.bf16.mxu0 %v1898_v0 }
 0x48e   : > { %1571 = vmatpush3.bf16.msra.mxu0 %v1723_v40 }
 0x48f   : > { %1572 = vmatprep.subr.bf16.mxu0 %v1898_v0 }
 0x492   : > { %1573 = vmatpush3.bf16.msra.mxu0 %v1724_v41 }
 0x548   : > { %v816_v33 = vpop.f32.mrb[8].mxu0 }
 0x549   : > { %v817_v34 = vadd.f32 %v1323_v32, %v816_v33  ;;  %v1536_v35 = vpop.f32.mrb[9].mxu0 }
 0x54a   : > { %v819_v36 = vpop.f32.mrb[10].mxu0 }
 0x54b   : > { %v822_v37 = vmax.f32 %v817_v34, 0.0  ;;  %v1537_v38 = vpop.f32.mrb[11].mxu0 }
 0x54d   : > { %v823_v39 = vpack.c.bf16 %v822_v37, %v822_v37 }
 0x54f   : > { %1555 = vmatmul.mubr.bf16.vlgmr.msra.gmra.mrb[8].mxu1 %v823_v39 }
 0x550   : > { %1594 = vmatprep.mubr.msk.bf16.mxu1 %vm1899_vm0, %v1898_v0  ;;  %1579 = vmatpush3.bf16.msra.mxu1 %v1725_v42 }
 0x551   : > { %1580 = vmatprep.subr.bf16.mxu1 %v1898_v0 }
 0x554   : > { %1581 = vmatpush3.bf16.msra.mxu1 %v1726_v43 }
 0x555   : > { %1582 = vmatprep.subr.bf16.mxu1 %v1898_v0 }
 0x558   : > { %1583 = vmatpush3.bf16.msra.mxu1 %v1727_v44 }
 0x559   : > { %1584 = vmatprep.subr.bf16.mxu1 %v1898_v0 }
 0x55c   : > { %1585 = vmatpush3.bf16.msra.mxu1 %v1728_v45 }
 0x55d   : > { %1586 = vmatprep.subr.bf16.mxu1 %v1898_v0 }
 0x560   : > { %1587 = vmatpush3.bf16.msra.mxu1 %v1729_v46 }
 0x561   : > { %1588 = vmatprep.subr.bf16.mxu1 %v1898_v0 }
 0x564   : > { %1589 = vmatpush3.bf16.msra.mxu1 %v1730_v47 }
 0x565   : > { %1590 = vmatprep.subr.bf16.mxu1 %v1898_v0 }
 0x568   : > { %1591 = vmatpush3.bf16.msra.mxu1 %v1731_v56 }
 0x569   : > { %1592 = vmatprep.subr.bf16.mxu1 %v1898_v0  ;;  %v1353_v0 = vld [vmem:[%s2266_s3 + $0x7] ss:$0 sm:$0xff] }
 0x56c   : > { %1593 = vmatpush3.bf16.msra.mxu1 %v1732_v57 }
 0x622   : > { %v931_v49 = vpop.f32.mrb[8].mxu1 }
 0x623   : > { %v932_v50 = vadd.f32 %v1333_v48, %v931_v49  ;;  %v1556_v51 = vpop.f32.mrb[9].mxu1 }
 0x624   : > { %v934_v52 = vpop.f32.mrb[10].mxu1 }
 0x625   : > { %v937_v53 = vmax.f32 %v932_v50, 0.0  ;;  %v1557_v54 = vpop.f32.mrb[11].mxu1 }
 0x627   : > { %v938_v55 = vpack.c.bf16 %v937_v53, %v937_v53 }
 0x629   : > { %1575 = vmatmul.mubr.bf16.vlgmr.msra.gmra.mrb[12].mxu0 %v938_v55 }
 0x6fc   : > { %v1046_v59 = vpop.f32.mrb[12].mxu0 }
 0x6fd   : > { %v1047_v60 = vadd.f32 %v1343_v58, %v1046_v59  ;;  %v1576_v61 = vpop.f32.mrb[13].mxu0 }
 0x6fe   : > { %v1049_v62 = vpop.f32.mrb[14].mxu0 }
 0x6ff   : > { %v1052_v63 = vmax.f32 %v1047_v60, 0.0  ;;  %v1577_v1 = vpop.f32.mrb[15].mxu0 }
 0x701   : > { %v1053_v2 = vpack.c.bf16 %v1052_v63, %v1052_v63 }
 0x703   : > { %1595 = vmatmul.mubr.bf16.vlgmr.msra.gmra.mrb[12].mxu1 %v1053_v2 }
 0x7d6   : > { %v1161_v3 = vpop.f32.mrb[12].mxu1 }
 0x7d7   : > { %v1162_v4 = vadd.f32 %v1353_v0, %v1161_v3  ;;  %v1596_v5 = vpop.f32.mrb[13].mxu1 }
 0x7d8   : > { %v1164_v6 = vpop.f32.mrb[14].mxu1 }
 0x7d9   : > { %1167 = vst [vmem:[%s241_s27] sm:$0xff] %v1162_v4  ;;  %v1597_v7 = vpop.f32.mrb[15].mxu1 }
 0x7da   : > { %1834 = shalt.err (!%p1831_p2)
}
 0x7db   : > { %s1835_s29 = scalar_lea.hbm %s2219_s26, 128  ;;  %s1839_s12 = scalar_lea.hbm %s2267_s4, 256 }
 0x7dc   : > { %p1836_p13 = scmp.ne.s32.totalorder %s2219_s26, %s1835_s29  ;;  %p1840_p4 = scmp.lt.u32.totalorder %s2219_s26, %s2267_s4 }
 0x7dd   : > { %p1841_p5 = scmp.lt.u32.totalorder %s1839_s12, %s1835_s29  ;;  %p1843_p11 = scmp.lt.u32.totalorder %s1835_s29, %s2219_s26 }
 0x7de   : > { %p1837_p6 = pnand %p1836_p13, %p2281_p0 }
 0x7df   : > { %p1842_p8 = por %p1841_p5, %p1840_p4 }
 0x7e0   : > { %p1838_p10 = pneg %p1837_p6 }
 0x7e1   : > { %p1844_p1 = por %p1843_p11, %p1842_p8 }
 0x7e3   : > { %p1845_p3 = pnand %p1844_p1, %p1838_p10 }
 0x7e5   : > { %1848 = shalt.err (!%p1845_p3)
}
 0x7e6   : > { %1608 = dma.vmem_to_hbm [thread:$0]  (%p2281_p0), %s2221_s30, 128, %s2219_s26, %s1169_s19  }
 0x7e7 PF: > { %s1194_s21 = sand.u32 1, %s1879_s15   ;;  %p2282_p7 = scmp.ne.s32.totalorder %s2272_s22, 0 }
 0x7e8   : > { %p2283_p9 = scmp.ge.s32.totalorder %s1891_s18, 2  ;;  %s1195_s23 = scalar_lea.sflag [#allocation4], %s1194_s21 }
 0x7ea   : > { %p1622_p12 = pnand %p2283_p9, %p2282_p7 }
 0x7ec   : > { %1874 = dma.done.wait (!%p1622_p12), %s1195_s23, 128  }
 0x7ed   : > { %1876 = vsyncadd (!%p1622_p12), %s1195_s23, 4294967168  ;;  %p18_p2 = scmp.ge.s32.totalorder %s2036_s9, 4   ;;  %s2284_s15 = smov %s1883_s16 }
 0x7ee   : > { %s2285_s16 = smov %s1887_s17  ;;  %s2286_s17 = smov %s2052_s14 }
 0x7ef   : > { %s2287_s18 = smov %s2036_s9  ;;  %20 = sbr.rel (!%p18_p2) target bundleno = 6 (0x6), region = 102 }
 0x7f6   :  { %1200 = vsyncpa [#allocation3], 1 }
 0x7f7   :  { %1202 = vsyncpa [#allocation3 + $0x1], 1 }
 0x7f8   :  { %1203 = vsyncpa [#allocation6], 1 }
 0x7f9   :  { %1204 = vsyncpa [#allocation4], 1 }
 0x7fa   :  { %1206 = vsyncpa [#allocation4 + $0x1], 1 }

</bundles_post_ra>
